<compile_context>
chip_gen: v6e
topology: v6e:2x2x1
jax: 0.10.0
libtpu: 0.0.40
codegen_flags: <defaults>
</compile_context>

<pallas_src>
import functools

import numpy as np
import jax
import jax.numpy as jnp
from jax.experimental import pallas as pl
from jax.experimental.pallas import tpu as pltpu

_LANE = 128
_SUBLANE = 8


def _rpad(n, m):
    return ((n + m - 1) // m) * m


# ----------------------------- fused Pallas kernel ---------------------------------
def _sage_dif_kernel(a_ref, x_ref, w_ref, b_ref, out_ref, *, plan):
    """Fully fused SAGE_dif forward (all branches, all layers, one call).

    plan (static Python metadata):
      in_feats,
      (l0_ws_row, l0_wn_row, l0_bias_row, l0_width,
       per-branch (col_off, f_out0, relu0, out_col0_or_None)),
      per-branch tuple of layer descriptors for layers >= 1:
       (ws_row, wn_row, f_in, f_out, bias_row, relu, out_col_or_None)
    """
    in_feats, (l0_ws_row, l0_wn_row, l0_b_row, l0_width, l0_branches), rest = plan

    a = a_ref[...]                      # (N, N) row-normalized adjacency ('mean')
    x = x_ref[...]                      # (N, in_feats) input node features

    # (1) shared neighbor aggregation of the input features — computed ONCE for all
    #     branches (this is the largest matmul in the kernel, K = N).
    ax = jnp.dot(a, x, preferred_element_type=jnp.float32)          # (N, in_feats)

    # (2) layer 0 fused across branches: one pair of lane-dense MXU passes.
    w0s = w_ref[l0_ws_row:l0_ws_row + in_feats, 0:l0_width]
    w0n = w_ref[l0_wn_row:l0_wn_row + in_feats, 0:l0_width]
    b0 = b_ref[l0_b_row:l0_b_row + 1, 0:l0_width]
    h0 = (jnp.dot(x, w0s, preferred_element_type=jnp.float32)
          + jnp.dot(ax, w0n, preferred_element_type=jnp.float32)
          + b0)                                                       # (N, sum f_out0)

    # (3) remaining layers per branch (static unroll; everything stays in VMEM/vregs).
    for (col_off, f_out0, relu0, out_col0), layers in zip(l0_branches, rest):
        h = h0[:, col_off:col_off + f_out0]
        if relu0:
            h = jnp.maximum(h, 0.0)
        if out_col0 is not None:
            out_ref[:, out_col0:out_col0 + f_out0] = h.astype(out_ref.dtype)

        for (ws_row, wn_row, f_in, f_out, b_row, relu, out_col) in layers:
            ws = w_ref[ws_row:ws_row + f_in, 0:f_out]
            wn = w_ref[wn_row:wn_row + f_in, 0:f_out]
            b = b_ref[b_row:b_row + 1, 0:f_out]
            if f_out < f_in:
                # classifier-style layer: aggregate in the smaller output space
                #   H@Ws + A@(H@Wn) + b   -> N^2*f_out instead of N^2*f_in MXU work
                h = (jnp.dot(h, ws, preferred_element_type=jnp.float32)
                     + jnp.dot(a,
                               jnp.dot(h, wn, preferred_element_type=jnp.float32),
                               preferred_element_type=jnp.float32)
                     + b)
            else:
                # two dots + add; with 2*f_in < 128 a merged-K pass buys nothing but
                # would force a lane-axis concat/relayout.
                hn = jnp.dot(a, h, preferred_element_type=jnp.float32)
                h = (jnp.dot(h, ws, preferred_element_type=jnp.float32)
                     + jnp.dot(hn, wn, preferred_element_type=jnp.float32)
                     + b)
            if relu:
                h = jnp.maximum(h, 0.0)
            if out_col is not None:
                out_ref[:, out_col:out_col + f_out] = h.astype(out_ref.dtype)


# ------------------------------ packing / plan building -----------------------------
def _build_plan_and_pack(branches, in_feats):
    """Pack all weights/biases into two lane-dense buffers and build static metadata."""
    # layer-0 fusion across branches (all branches consume the same x / A@x)
    l0_ws = [layers[0][0] for layers in branches]
    l0_wn = [layers[0][1] for layers in branches]
    l0_b = [layers[0][2] for layers in branches]
    l0_widths = [int(w.shape[1]) for w in l0_ws]
    l0_width = sum(l0_widths)

    # widest column slice ever read -> lane padding of the packed buffers
    max_cols = l0_width
    for layers in branches:
        for (ws, _wn, _b, _r, _e) in layers[1:]:
            max_cols = max(max_cols, int(ws.shape[1]))
    cols = _rpad(max_cols, _LANE)

    w_blocks, b_rows = [], []

    def add_w(mat):
        off = sum(_rpad(int(m.shape[0]), _SUBLANE) for m in w_blocks)
        w_blocks.append(mat)
        return off

    def add_b(vec):
        off = len(b_rows)
        b_rows.append(vec)
        return off

    l0_ws_row = add_w(jnp.concatenate(l0_ws, axis=1))     # (in_feats, l0_width)
    l0_wn_row = add_w(jnp.concatenate(l0_wn, axis=1))
    l0_b_row = add_b(jnp.concatenate(l0_b, axis=0))

    out_col = 0
    col_off = 0
    l0_branch_plan, rest_plan, out_map = [], [], []
    for layers in branches:
        n_l = len(layers)
        feat_slots = []
        logits_slot = None

        ws0, _wn0, _b0, relu0, emit0 = layers[0]
        f_out0 = int(ws0.shape[1])
        is_last0 = (n_l == 1)
        out_col0 = None
        if emit0 or is_last0:
            out_col0 = out_col
            out_col += f_out0
            if emit0:
                feat_slots.append((out_col0, f_out0))
            if is_last0:
                logits_slot = (out_col0, f_out0)
        l0_branch_plan.append((col_off, f_out0, bool(relu0), out_col0))
        col_off += f_out0

        layer_plans = []
        for li in range(1, n_l):
            ws, wn, b, relu, emit = layers[li]
            f_in, f_out = int(ws.shape[0]), int(ws.shape[1])
            ws_row = add_w(ws)
            wn_row = add_w(wn)
            b_row = add_b(b)
            is_last = (li == n_l - 1)
            this_col = None
            if emit or is_last:
                this_col = out_col
                out_col += f_out
                if emit:
                    feat_slots.append((this_col, f_out))
                if is_last:
                    logits_slot = (this_col, f_out)
            layer_plans.append((ws_row, wn_row, f_in, f_out, b_row, bool(relu), this_col))
        rest_plan.append(tuple(layer_plans))
        out_map.append((feat_slots, logits_slot))

    # materialize the packed buffers (static data layout, done host/XLA-side once)
    def pad_block(mat):
        mat = mat.astype(jnp.float32)
        r = _rpad(int(mat.shape[0]), _SUBLANE)
        return jnp.pad(mat, ((0, r - mat.shape[0]), (0, cols - mat.shape[1])))

    w_packed = jnp.concatenate([pad_block(m) for m in w_blocks], axis=0)
    b_mat = jnp.stack(
        [jnp.pad(v.astype(jnp.float32), (0, cols - int(v.shape[0]))) for v in b_rows],
        axis=0)
    b_packed = jnp.pad(b_mat, ((0, _rpad(len(b_rows), _SUBLANE) - len(b_rows)), (0, 0)))

    plan = (in_feats,
            (l0_ws_row, l0_wn_row, l0_b_row, l0_width, tuple(l0_branch_plan)),
            tuple(rest_plan))
    out_width = _rpad(max(out_col, _LANE), _LANE)
    return w_packed, b_packed, plan, out_map, out_width


# --------------------------------- wrapper -----------------------------------------
def sage_dif_forward(a_norm, x, branches):
    """Fused SAGE_dif forward (single pallas_call).

    branches: list over branches; each branch is a list of layers
              (w_self, w_neigh, bias, apply_relu, emit_feat); the last layer of each
              branch produces that branch's logits.
    Returns (logits stacked to (num_branches, N, n_classes), featss list-of-lists),
    matching SAGE_dif.forward (dropout p=0 -> identity).
    """
    N, in_feats = x.shape
    w_packed, b_packed, plan, out_map, out_width = _build_plan_and_pack(branches, in_feats)

    kernel = functools.partial(_sage_dif_kernel, plan=plan)

    # footprint-derived VMEM limit with headroom (clamped), instead of a hard-coded 32MiB
    operand_bytes = sum(int(np.prod(a.shape)) * int(a.dtype.itemsize)
                        for a in (a_norm, x, w_packed, b_packed))
    out_bytes = N * out_width * 4
    vmem_limit = int(min(96 * 1024 * 1024,
                         max(16 * 1024 * 1024, 3 * (operand_bytes + out_bytes))))

    packed_out = pl.pallas_call(
        kernel,
        out_shape=jax.ShapeDtypeStruct((N, out_width), jnp.float32),
        # grid-less call: every operand / result is a whole-array VMEM block
        in_specs=[pl.BlockSpec(memory_space=pltpu.MemorySpace.VMEM)] * 4,
        out_specs=pl.BlockSpec(memory_space=pltpu.MemorySpace.VMEM),
        compiler_params=pltpu.CompilerParams(vmem_limit_bytes=vmem_limit),
    )(a_norm.astype(jnp.float32), x.astype(jnp.float32), w_packed, b_packed)

    # slice the single lane-dense output back into (logits, featss)
    logits, featss = [], []
    for feat_slots, logits_slot in out_map:
        featss.append([packed_out[:, c:c + w] for (c, w) in feat_slots])
        c, w = logits_slot
        logits.append(packed_out[:, c:c + w])
    return jnp.stack(logits, axis=0), featss


# --------------------------- params (synthetic, deterministic) ----------------------
def init_sage_dif_params(key, in_feats, n_hidden1, n_hidden2, n_classes,
                         n_layers, num_branches):
    """Each SAGEConv = (W_self, W_neigh, bias); flags = (apply_relu, emit_feat).

    Even branch i : GraphSAGE(in_feats, n_hidden1, n_classes, n_layers)    -> n_layers+1 convs
    Odd  branch i : GraphSAGE(in_feats, n_hidden2, n_hidden1, n_layers-2)  -> n_layers-1 convs
                    (its un-activated output `emb` is appended to feats)
                    + SAGEConv(n_hidden1, n_classes) classifier head.
    """
    assert n_layers >= 3, "odd branches require n_layers - 2 >= 1"
    branches = []
    for i in range(num_branches):
        if i % 2 == 0:
            dims = ([(in_feats, n_hidden1)]
                    + [(n_hidden1, n_hidden1)] * (n_layers - 1)
                    + [(n_hidden1, n_classes)])
            flags = [(True, True)] * (len(dims) - 1) + [(False, False)]
        else:
            base = ([(in_feats, n_hidden2)]
                    + [(n_hidden2, n_hidden2)] * (n_layers - 3)
                    + [(n_hidden2, n_hidden1)])
            dims = base + [(n_hidden1, n_classes)]
            flags = ([(True, True)] * (len(base) - 1)
                     + [(False, True)]      # emb: no ReLU, goes into featss
                     + [(False, False)])    # classifier head -> logits
        layers = []
        for (fi, fo), (relu, emit) in zip(dims, flags):
            key, k1, k2, k3 = jax.random.split(key, 4)
            scale = 1.0 / np.sqrt(fi)
            layers.append((
                jax.random.uniform(k1, (fi, fo), jnp.float32, -scale, scale),
                jax.random.uniform(k2, (fi, fo), jnp.float32, -scale, scale),
                jax.random.uniform(k3, (fo,),    jnp.float32, -scale, scale),
                relu, emit,
            ))
        branches.append(layers)
    return branches


# ------------------------------ pure-JAX reference ---------------------------------
def sage_dif_reference(a_norm, x, branches):
    outputs, featss = [], []
    for layers in branches:
        h = x
        feats = []
        branch_logits = None
        for li, (ws, wn, b, relu, emit) in enumerate(layers):
            is_last = (li == len(layers) - 1)
            h = h @ ws + (a_norm @ h) @ wn + b
            if relu:
                h = jnp.maximum(h, 0.0)
            if emit:
                feats.append(h)
            if is_last:
                branch_logits = h
        outputs.append(branch_logits[None])
        featss.append(feats)
    return jnp.concatenate(outputs, axis=0), featss


# ------------------------------------- main -----------------------------------------
if __name__ == "__main__":
    # small config consistent with the module
    N = 128             # number of graph nodes
    in_feats = 32
    n_hidden1 = 32
    n_hidden2 = 16
    n_classes = 8
    n_layers = 3        # even branch: 4 convs; odd branch: 2 convs + classifier head
    num_branches = 2    # one even (full GraphSAGE) + one odd (embedding + head) branch

    key = jax.random.PRNGKey(0)
    k_x, k_adj, k_p = jax.random.split(key, 3)

    # node features
    x = jax.random.normal(k_x, (N, in_feats), jnp.float32)

    # random directed graph as dense adjacency (dst, src); row-normalize -> 'mean' aggregator
    adj = (jax.random.uniform(k_adj, (N, N)) < 0.1).astype(jnp.float32)
    deg = jnp.maximum(adj.sum(axis=1, keepdims=True), 1.0)
    a_norm = adj / deg

    branches = init_sage_dif_params(k_p, in_feats, n_hidden1, n_hidden2, n_classes,
                                    n_layers, num_branches)

    out, featss = sage_dif_forward(a_norm, x, branches)
    out = jax.block_until_ready(out)

    # sanity: shapes + numerical match vs pure-JAX reference
    ref_out, ref_featss = sage_dif_reference(a_norm, x, branches)
    assert out.shape == (num_branches, N, n_classes), out.shape
    assert len(featss) == num_branches
    assert [f.shape for f in featss[0]] == [(N, n_hidden1)] * n_layers
    assert [f.shape for f in featss[1]] == \
        [(N, n_hidden2)] * (n_layers - 2) + [(N, n_hidden1)]
    np.testing.assert_allclose(np.asarray(out), np.asarray(ref_out), rtol=1e-4, atol=1e-4)
    for fb, rb in zip(featss, ref_featss):
        assert len(fb) == len(rb)
        for f, r in zip(fb, rb):
            np.testing.assert_allclose(np.asarray(f), np.asarray(r), rtol=1e-4, atol=1e-4)

    print("KERNEL_OK")
</pallas_src>

<mosaic_0001>
module attributes {stable_mosaic.version = 11 : i64} {
  func.func @_sage_dif_kernel(%arg0: memref<128x128xf32, #tpu.memory_space<vmem>>, %arg1: memref<128x32xf32, #tpu.memory_space<vmem>>, %arg2: memref<352x128xf32, #tpu.memory_space<vmem>>, %arg3: memref<8x128xf32, #tpu.memory_space<vmem>>, %arg4: memref<128x256xf32, #tpu.memory_space<vmem>>) attributes {dimension_semantics = [], scalar_prefetch = 0 : i64, scratch_operands = 0 : i64, tpu.core_type = #tpu.core_type<tc>} {
    %c0 = arith.constant 0 : index
    %c0_0 = arith.constant 0 : index
    %0 = vector.load %arg0[%c0, %c0_0] : memref<128x128xf32, #tpu.memory_space<vmem>>, vector<128x128xf32>
    %c0_1 = arith.constant 0 : index
    %c0_2 = arith.constant 0 : index
    %1 = vector.load %arg1[%c0_1, %c0_2] : memref<128x32xf32, #tpu.memory_space<vmem>>, vector<128x32xf32>
    %cst = arith.constant dense<0.000000e+00> : vector<128x32xf32>
    %2 = tpu.matmul %0, %1, %cst {dimension_numbers = #tpu.dot_dimension_numbers<[1], [0], [0], [1], [0, 0, 1, 1], [], []>} : vector<128x128xf32>, vector<128x32xf32>, vector<128x32xf32> -> vector<128x32xf32>
    %c0_3 = arith.constant 0 : index
    %c0_4 = arith.constant 0 : index
    %3 = vector.load %arg2[%c0_3, %c0_4] : memref<352x128xf32, #tpu.memory_space<vmem>>, vector<32x48xf32>
    %c32 = arith.constant 32 : index
    %c0_5 = arith.constant 0 : index
    %4 = vector.load %arg2[%c32, %c0_5] : memref<352x128xf32, #tpu.memory_space<vmem>>, vector<32x48xf32>
    %c0_6 = arith.constant 0 : index
    %c0_7 = arith.constant 0 : index
    %5 = vector.load %arg3[%c0_6, %c0_7] : memref<8x128xf32, #tpu.memory_space<vmem>>, vector<1x48xf32>
    %cst_8 = arith.constant dense<0.000000e+00> : vector<128x48xf32>
    %6 = tpu.matmul %1, %3, %cst_8 {dimension_numbers = #tpu.dot_dimension_numbers<[1], [0], [0], [1], [0, 0, 1, 1], [], []>} : vector<128x32xf32>, vector<32x48xf32>, vector<128x48xf32> -> vector<128x48xf32>
    %cst_9 = arith.constant dense<0.000000e+00> : vector<128x48xf32>
    %7 = tpu.matmul %2, %4, %cst_9 {dimension_numbers = #tpu.dot_dimension_numbers<[1], [0], [0], [1], [0, 0, 1, 1], [], []>} : vector<128x32xf32>, vector<32x48xf32>, vector<128x48xf32> -> vector<128x48xf32>
    %8 = arith.addf %6, %7 : vector<128x48xf32>
    %9 = vector.broadcast %5 : vector<1x48xf32> to vector<128x48xf32>
    %10 = arith.addf %8, %9 : vector<128x48xf32>
    %11 = vector.extract_strided_slice %10 {offsets = [0, 0], sizes = [128, 32], strides = [1, 1]} : vector<128x48xf32> to vector<128x32xf32>
    %cst_10 = arith.constant 0.000000e+00 : f32
    %12 = vector.broadcast %cst_10 : f32 to vector<128x32xf32>
    %13 = arith.maximumf %11, %12 : vector<128x32xf32>
    %c0_11 = arith.constant 0 : index
    %c0_12 = arith.constant 0 : index
    %14 = vector.load %arg4[%c0_11, %c0_12] : memref<128x256xf32, #tpu.memory_space<vmem>>, vector<128x32xf32>
    tpu.vector_store %arg4[%c0_11, %c0_12], %13 {strides = array<i32>} : memref<128x256xf32, #tpu.memory_space<vmem>>, vector<128x32xf32>,
    %c64 = arith.constant 64 : index
    %c0_13 = arith.constant 0 : index
    %15 = vector.load %arg2[%c64, %c0_13] : memref<352x128xf32, #tpu.memory_space<vmem>>, vector<32x32xf32>
    %c96 = arith.constant 96 : index
    %c0_14 = arith.constant 0 : index
    %16 = vector.load %arg2[%c96, %c0_14] : memref<352x128xf32, #tpu.memory_space<vmem>>, vector<32x32xf32>
    %c1 = arith.constant 1 : index
    %c0_15 = arith.constant 0 : index
    %17 = vector.load %arg3[%c1, %c0_15] : memref<8x128xf32, #tpu.memory_space<vmem>>, vector<1x32xf32>
    %cst_16 = arith.constant dense<0.000000e+00> : vector<128x32xf32>
    %18 = tpu.matmul %0, %13, %cst_16 {dimension_numbers = #tpu.dot_dimension_numbers<[1], [0], [0], [1], [0, 0, 1, 1], [], []>} : vector<128x128xf32>, vector<128x32xf32>, vector<128x32xf32> -> vector<128x32xf32>
    %cst_17 = arith.constant dense<0.000000e+00> : vector<128x32xf32>
    %19 = tpu.matmul %13, %15, %cst_17 {dimension_numbers = #tpu.dot_dimension_numbers<[1], [0], [0], [1], [0, 0, 1, 1], [], []>} : vector<128x32xf32>, vector<32x32xf32>, vector<128x32xf32> -> vector<128x32xf32>
    %cst_18 = arith.constant dense<0.000000e+00> : vector<128x32xf32>
    %20 = tpu.matmul %18, %16, %cst_18 {dimension_numbers = #tpu.dot_dimension_numbers<[1], [0], [0], [1], [0, 0, 1, 1], [], []>} : vector<128x32xf32>, vector<32x32xf32>, vector<128x32xf32> -> vector<128x32xf32>
    %21 = arith.addf %19, %20 : vector<128x32xf32>
    %22 = vector.broadcast %17 : vector<1x32xf32> to vector<128x32xf32>
    %23 = arith.addf %21, %22 : vector<128x32xf32>
    %cst_19 = arith.constant 0.000000e+00 : f32
    %24 = vector.broadcast %cst_19 : f32 to vector<128x32xf32>
    %25 = arith.maximumf %23, %24 : vector<128x32xf32>
    %c0_20 = arith.constant 0 : index
    %c32_21 = arith.constant 32 : index
    %26 = vector.load %arg4[%c0_20, %c32_21] : memref<128x256xf32, #tpu.memory_space<vmem>>, vector<128x32xf32>
    tpu.vector_store %arg4[%c0_20, %c32_21], %25 {strides = array<i32>} : memref<128x256xf32, #tpu.memory_space<vmem>>, vector<128x32xf32>,
    %c128 = arith.constant 128 : index
    %c0_22 = arith.constant 0 : index
    %27 = vector.load %arg2[%c128, %c0_22] : memref<352x128xf32, #tpu.memory_space<vmem>>, vector<32x32xf32>
    %c160 = arith.constant 160 : index
    %c0_23 = arith.constant 0 : index
    %28 = vector.load %arg2[%c160, %c0_23] : memref<352x128xf32, #tpu.memory_space<vmem>>, vector<32x32xf32>
    %c2 = arith.constant 2 : index
    %c0_24 = arith.constant 0 : index
    %29 = vector.load %arg3[%c2, %c0_24] : memref<8x128xf32, #tpu.memory_space<vmem>>, vector<1x32xf32>
    %cst_25 = arith.constant dense<0.000000e+00> : vector<128x32xf32>
    %30 = tpu.matmul %0, %25, %cst_25 {dimension_numbers = #tpu.dot_dimension_numbers<[1], [0], [0], [1], [0, 0, 1, 1], [], []>} : vector<128x128xf32>, vector<128x32xf32>, vector<128x32xf32> -> vector<128x32xf32>
    %cst_26 = arith.constant dense<0.000000e+00> : vector<128x32xf32>
    %31 = tpu.matmul %25, %27, %cst_26 {dimension_numbers = #tpu.dot_dimension_numbers<[1], [0], [0], [1], [0, 0, 1, 1], [], []>} : vector<128x32xf32>, vector<32x32xf32>, vector<128x32xf32> -> vector<128x32xf32>
    %cst_27 = arith.constant dense<0.000000e+00> : vector<128x32xf32>
    %32 = tpu.matmul %30, %28, %cst_27 {dimension_numbers = #tpu.dot_dimension_numbers<[1], [0], [0], [1], [0, 0, 1, 1], [], []>} : vector<128x32xf32>, vector<32x32xf32>, vector<128x32xf32> -> vector<128x32xf32>
    %33 = arith.addf %31, %32 : vector<128x32xf32>
    %34 = vector.broadcast %29 : vector<1x32xf32> to vector<128x32xf32>
    %35 = arith.addf %33, %34 : vector<128x32xf32>
    %cst_28 = arith.constant 0.000000e+00 : f32
    %36 = vector.broadcast %cst_28 : f32 to vector<128x32xf32>
    %37 = arith.maximumf %35, %36 : vector<128x32xf32>
    %c0_29 = arith.constant 0 : index
    %c64_30 = arith.constant 64 : index
    %38 = vector.load %arg4[%c0_29, %c64_30] : memref<128x256xf32, #tpu.memory_space<vmem>>, vector<128x32xf32>
    tpu.vector_store %arg4[%c0_29, %c64_30], %37 {strides = array<i32>} : memref<128x256xf32, #tpu.memory_space<vmem>>, vector<128x32xf32>,
    %c192 = arith.constant 192 : index
    %c0_31 = arith.constant 0 : index
    %39 = vector.load %arg2[%c192, %c0_31] : memref<352x128xf32, #tpu.memory_space<vmem>>, vector<32x8xf32>
    %c224 = arith.constant 224 : index
    %c0_32 = arith.constant 0 : index
    %40 = vector.load %arg2[%c224, %c0_32] : memref<352x128xf32, #tpu.memory_space<vmem>>, vector<32x8xf32>
    %c3 = arith.constant 3 : index
    %c0_33 = arith.constant 0 : index
    %41 = vector.load %arg3[%c3, %c0_33] : memref<8x128xf32, #tpu.memory_space<vmem>>, vector<1x8xf32>
    %cst_34 = arith.constant dense<0.000000e+00> : vector<128x8xf32>
    %42 = tpu.matmul %37, %39, %cst_34 {dimension_numbers = #tpu.dot_dimension_numbers<[1], [0], [0], [1], [0, 0, 1, 1], [], []>} : vector<128x32xf32>, vector<32x8xf32>, vector<128x8xf32> -> vector<128x8xf32>
    %cst_35 = arith.constant dense<0.000000e+00> : vector<128x8xf32>
    %43 = tpu.matmul %37, %40, %cst_35 {dimension_numbers = #tpu.dot_dimension_numbers<[1], [0], [0], [1], [0, 0, 1, 1], [], []>} : vector<128x32xf32>, vector<32x8xf32>, vector<128x8xf32> -> vector<128x8xf32>
    %cst_36 = arith.constant dense<0.000000e+00> : vector<128x8xf32>
    %44 = tpu.matmul %0, %43, %cst_36 {dimension_numbers = #tpu.dot_dimension_numbers<[1], [0], [0], [1], [0, 0, 1, 1], [], []>} : vector<128x128xf32>, vector<128x8xf32>, vector<128x8xf32> -> vector<128x8xf32>
    %45 = arith.addf %42, %44 : vector<128x8xf32>
    %46 = vector.broadcast %41 : vector<1x8xf32> to vector<128x8xf32>
    %47 = arith.addf %45, %46 : vector<128x8xf32>
    %c0_37 = arith.constant 0 : index
    %c96_38 = arith.constant 96 : index
    %48 = vector.load %arg4[%c0_37, %c96_38] : memref<128x256xf32, #tpu.memory_space<vmem>>, vector<128x8xf32>
    tpu.vector_store %arg4[%c0_37, %c96_38], %47 {strides = array<i32>} : memref<128x256xf32, #tpu.memory_space<vmem>>, vector<128x8xf32>,
    %49 = vector.extract_strided_slice %10 {offsets = [0, 32], sizes = [128, 16], strides = [1, 1]} : vector<128x48xf32> to vector<128x16xf32>
    %cst_39 = arith.constant 0.000000e+00 : f32
    %50 = vector.broadcast %cst_39 : f32 to vector<128x16xf32>
    %51 = arith.maximumf %49, %50 : vector<128x16xf32>
    %c0_40 = arith.constant 0 : index
    %c104 = arith.constant 104 : index
    %52 = vector.load %arg4[%c0_40, %c104] : memref<128x256xf32, #tpu.memory_space<vmem>>, vector<128x16xf32>
    tpu.vector_store %arg4[%c0_40, %c104], %51 {strides = array<i32>} : memref<128x256xf32, #tpu.memory_space<vmem>>, vector<128x16xf32>,
    %c256 = arith.constant 256 : index
    %c0_41 = arith.constant 0 : index
    %53 = vector.load %arg2[%c256, %c0_41] : memref<352x128xf32, #tpu.memory_space<vmem>>, vector<16x32xf32>
    %c272 = arith.constant 272 : index
    %c0_42 = arith.constant 0 : index
    %54 = vector.load %arg2[%c272, %c0_42] : memref<352x128xf32, #tpu.memory_space<vmem>>, vector<16x32xf32>
    %c4 = arith.constant 4 : index
    %c0_43 = arith.constant 0 : index
    %55 = vector.load %arg3[%c4, %c0_43] : memref<8x128xf32, #tpu.memory_space<vmem>>, vector<1x32xf32>
    %cst_44 = arith.constant dense<0.000000e+00> : vector<128x16xf32>
    %56 = tpu.matmul %0, %51, %cst_44 {dimension_numbers = #tpu.dot_dimension_numbers<[1], [0], [0], [1], [0, 0, 1, 1], [], []>} : vector<128x128xf32>, vector<128x16xf32>, vector<128x16xf32> -> vector<128x16xf32>
    %cst_45 = arith.constant dense<0.000000e+00> : vector<128x32xf32>
    %57 = tpu.matmul %51, %53, %cst_45 {dimension_numbers = #tpu.dot_dimension_numbers<[1], [0], [0], [1], [0, 0, 1, 1], [], []>} : vector<128x16xf32>, vector<16x32xf32>, vector<128x32xf32> -> vector<128x32xf32>
    %cst_46 = arith.constant dense<0.000000e+00> : vector<128x32xf32>
    %58 = tpu.matmul %56, %54, %cst_46 {dimension_numbers = #tpu.dot_dimension_numbers<[1], [0], [0], [1], [0, 0, 1, 1], [], []>} : vector<128x16xf32>, vector<16x32xf32>, vector<128x32xf32> -> vector<128x32xf32>
    %59 = arith.addf %57, %58 : vector<128x32xf32>
    %60 = vector.broadcast %55 : vector<1x32xf32> to vector<128x32xf32>
    %61 = arith.addf %59, %60 : vector<128x32xf32>
    %c0_47 = arith.constant 0 : index
    %c120 = arith.constant 120 : index
    %62 = vector.load %arg4[%c0_47, %c120] : memref<128x256xf32, #tpu.memory_space<vmem>>, vector<128x32xf32>
    tpu.vector_store %arg4[%c0_47, %c120], %61 {strides = array<i32>} : memref<128x256xf32, #tpu.memory_space<vmem>>, vector<128x32xf32>,
    %c288 = arith.constant 288 : index
    %c0_48 = arith.constant 0 : index
    %63 = vector.load %arg2[%c288, %c0_48] : memref<352x128xf32, #tpu.memory_space<vmem>>, vector<32x8xf32>
    %c320 = arith.constant 320 : index
    %c0_49 = arith.constant 0 : index
    %64 = vector.load %arg2[%c320, %c0_49] : memref<352x128xf32, #tpu.memory_space<vmem>>, vector<32x8xf32>
    %c5 = arith.constant 5 : index
    %c0_50 = arith.constant 0 : index
    %65 = vector.load %arg3[%c5, %c0_50] : memref<8x128xf32, #tpu.memory_space<vmem>>, vector<1x8xf32>
    %cst_51 = arith.constant dense<0.000000e+00> : vector<128x8xf32>
    %66 = tpu.matmul %61, %63, %cst_51 {dimension_numbers = #tpu.dot_dimension_numbers<[1], [0], [0], [1], [0, 0, 1, 1], [], []>} : vector<128x32xf32>, vector<32x8xf32>, vector<128x8xf32> -> vector<128x8xf32>
    %cst_52 = arith.constant dense<0.000000e+00> : vector<128x8xf32>
    %67 = tpu.matmul %61, %64, %cst_52 {dimension_numbers = #tpu.dot_dimension_numbers<[1], [0], [0], [1], [0, 0, 1, 1], [], []>} : vector<128x32xf32>, vector<32x8xf32>, vector<128x8xf32> -> vector<128x8xf32>
    %cst_53 = arith.constant dense<0.000000e+00> : vector<128x8xf32>
    %68 = tpu.matmul %0, %67, %cst_53 {dimension_numbers = #tpu.dot_dimension_numbers<[1], [0], [0], [1], [0, 0, 1, 1], [], []>} : vector<128x128xf32>, vector<128x8xf32>, vector<128x8xf32> -> vector<128x8xf32>
    %69 = arith.addf %66, %68 : vector<128x8xf32>
    %70 = vector.broadcast %65 : vector<1x8xf32> to vector<128x8xf32>
    %71 = arith.addf %69, %70 : vector<128x8xf32>
    %c0_54 = arith.constant 0 : index
    %c152 = arith.constant 152 : index
    %72 = vector.load %arg4[%c0_54, %c152] : memref<128x256xf32, #tpu.memory_space<vmem>>, vector<128x8xf32>
    tpu.vector_store %arg4[%c0_54, %c152], %71 {strides = array<i32>} : memref<128x256xf32, #tpu.memory_space<vmem>>, vector<128x8xf32>,
    return
  }
}

</mosaic_0001>

<bundles_post_ra>
// kernel: tpu_custom_call.1
= control target key start
LH: loop header
LB: loop body
LE: loop exit
PB: predicated region body
PF: predicated region fallthrough
CT: control target
= control target key end

     0   :  { %9 = vsyncpa [#allocation3], 0  ;;  %s6820_s0 = inlined_call_operand.vmem [shape: f32[128,128], index: 0, kind: input, shape index: {}]   ;;  %s6821_s1 = inlined_call_operand.vmem [shape: f32[128,32], index: 1, kind: input, shape index: {}]   ;;  %s6822_s2 = inlined_call_operand.hbm [shape: f32[352,128], index: 2, kind: input, shape index: {}]   ;;  %s6823_s3 = inlined_call_operand.vmem [shape: f32[8,128], index: 3, kind: input, shape index: {}]   ;;  %s6824_s4 = inlined_call_operand.hbm [shape: f32[128,256], index: 4, kind: output, shape index: {}]  }
   0x1   :  { %10 = vsyncpa [#allocation4], 0  ;;  %s5335_s15 = smov [#allocation2]  }
   0x2   :  { %s20_s16 = sshll.u32 %s5335_s15, 4  ;;  %s21_s16 = int_to_ptr.vmem [resolvable:$true] %s20_s16 }
   0x3   :  { %s5299_s17 = scalar_lea.vmem %s21_s16, 5632  ;;  %p5304_p1 = scmp.lt.s32.totalorder %s21_s16, %s21_s16 }
   0x4   :  { %p5300_p0 = scmp.ne.s32.totalorder %s21_s16, %s5299_s17  ;;  %p5305_p2 = scmp.lt.s32.totalorder %s5299_s17, %s5299_s17 }
   0x6   :  { %p5306_p3 = por %p5305_p2, %p5304_p1 }
   0x8   :  { %p5307_p4 = pnand %p5306_p3, %p5300_p0 }
   0xa   :  { %5310 = shalt.err (!%p5307_p4)
}
   0xb   :  { %s5336_s18 = smov 128   ;;  %s5337_s19 = smov 8  }
   0xc   :  { %26 = dma.hbm_to_vmem [thread:$0]  %s6822_s2, 5632, %s21_s16, [#allocation3], %s5336_s18, %s5336_s18, %s5337_s19  }
   0xd   :  { %5331 = dma.done.wait [#allocation3], 5632  }
   0xe   :  { %5332 = vsyncadd [#allocation3], 4294961664  ;;  %v5378_v0 = vld [vmem:[%s6821_s1 + $0x78] sm:$0xff]  ;;  %v5383_v1 = vld [vmem:[%s6821_s1 + $0x70] sm:$0xff]  ;;  %vm218_vm0 = vcmask 261120   ;;  %s5339_s6 = smov 72  }
   0xf   :  { %4504 = vmatprep.subr.mxu0 %v5378_v0  ;;  %v5390_v2 = vld [vmem:[%s6821_s1 + $0x68] sm:$0xff]  ;;  %v5397_v3 = vld [vmem:[%s6821_s1 + $0x60] sm:$0xff]  ;;  %v5409_v5 = vld [vmem:[%s6821_s1 + $0x58] sm:$0xff]  ;;  %s5340_s9 = smov 32   ;;  %vm1297_vm1 = vcmask 523520   ;;  %s5341_s17 = smov 64  }
  0x10   :  { %4505 = vmatpush3.msra.mxu0 %v5378_v0  ;;  %v5403_v4 = vld [vmem:[%s6820_s0] sm:$0xff]  ;;  %v5417_v6 = vld [vmem:[%s6821_s1 + $0x50] sm:$0xff]  ;;  %v5424_v7 = vld [vmem:[%s6821_s1 + $0x48] sm:$0xff]  ;;  %vm1938_vm2 = vcmask 785920   ;;  %vm2795_vm3 = vcmask 130048   ;;  %vm2515_vm4 = vcmask 851712  }
  0x11   :  { %4506 = vmatprep.subr.mxu0 %v5383_v1  ;;  %4536 = vmatprep.mubr.f32.mxu0 %v5403_v4  ;;  %v216_v8 = vld [vmem:[#allocation2 + $0x38] sm:$0xff]  ;;  %v215_v9 = vld [vmem:[#allocation2 + $0x30] sm:$0xff]  ;;  %v5431_v10 = vld [vmem:[%s6821_s1 + $0x40] sm:$0xff]  ;;  %vm2580_vm5 = vcmask 982848   ;;  %s5342_s21 = smov 120   ;;  %vm3250_vm6 = vcmask 1048512  }
  0x12   :  { %4507 = vmatpush3.msra.mxu0 %v5383_v1  ;;  %4560 = vmatprep.subr.mxu1 %v216_v8  ;;  %v5438_v11 = vld [vmem:[%s6821_s1 + $0x38] sm:$0xff]  ;;  %v5445_v12 = vld [vmem:[%s6821_s1 + $0x30] sm:$0xff]  ;;  %v5452_v13 = vld [vmem:[%s6821_s1 + $0x28] sm:$0xff]  ;;  %vm3252_vm7 = vcmask 195584   ;;  %vm3844_vm8 = vcmask 261312  }
  0x13   :  { %4508 = vmatprep.subr.mxu0 %v5390_v2  ;;  %4561 = vmatpush3.msra.mxu1 %v216_v8  ;;  %v5459_v14 = vld [vmem:[%s6821_s1 + $0x20] sm:$0xff]  ;;  %v5466_v15 = vld [vmem:[%s6821_s1 + $0x18] sm:$0xff]  ;;  %v5473_v16 = vld [vmem:[%s6821_s1 + $0x10] sm:$0xff] }
  0x14   :  { %4509 = vmatpush3.msra.mxu0 %v5390_v2  ;;  %4562 = vmatprep.subr.mxu1 %v215_v9  ;;  %v5480_v17 = vld [vmem:[%s6821_s1 + $0x8] sm:$0xff]  ;;  %v5487_v18 = vld [vmem:[%s6821_s1] sm:$0xff]  ;;  %v5500_v20 = vld [vmem:[%s6820_s0 + $0x10] sm:$0xff]  ;;  %s5338_s1 = smov 96  }
  0x15   :  { %4510 = vmatprep.subr.mxu0 %v5397_v3  ;;  %4563 = vmatpush3.msra.mxu1 %v215_v9  ;;  %v5494_v19 = vld [vmem:[%s6820_s0 + $0x8] sm:$0xff]  ;;  %v5508_v21 = vld [vmem:[%s6820_s0 + $0x18] sm:$0xff]  ;;  %v5513_v22 = vld [vmem:[%s6820_s0 + $0x20] sm:$0xff] }
  0x16   :  { %4511 = vmatpush3.msra.mxu0 %v5397_v3  ;;  %v5520_v23 = vld [vmem:[%s6820_s0 + $0x28] sm:$0xff]  ;;  %v5525_v24 = vld [vmem:[%s6820_s0 + $0x30] sm:$0xff]  ;;  %v5532_v25 = vld [vmem:[%s6820_s0 + $0x38] sm:$0xff] }
  0x17   :  { %4512 = vmatprep.subr.mxu0 %v5409_v5  ;;  %v5537_v26 = vld [vmem:[%s6820_s0 + $0x40] sm:$0xff]  ;;  %v5544_v27 = vld [vmem:[%s6820_s0 + $0x48] sm:$0xff]  ;;  %v5549_v28 = vld [vmem:[%s6820_s0 + $0x50] sm:$0xff] }
  0x18   :  { %4513 = vmatpush3.msra.mxu0 %v5409_v5  ;;  %v5556_v29 = vld [vmem:[%s6820_s0 + $0x58] sm:$0xff]  ;;  %v5561_v30 = vld [vmem:[%s6820_s0 + $0x60] sm:$0xff]  ;;  %v5568_v31 = vld [vmem:[%s6820_s0 + $0x68] sm:$0xff] }
  0x19   :  { %4514 = vmatprep.subr.mxu0 %v5417_v6  ;;  %v5573_v32 = vld [vmem:[%s6820_s0 + $0x70] sm:$0xff]  ;;  %v5580_v33 = vld [vmem:[%s6820_s0 + $0x78] sm:$0xff]  ;;  %v214_v34 = vld [vmem:[#allocation2 + $0x28] sm:$0xff] }
  0x1a   :  { %4515 = vmatpush3.msra.mxu0 %v5417_v6  ;;  %4564 = vmatprep.subr.mxu1 %v214_v34  ;;  %v213_v35 = vld [vmem:[#allocation2 + $0x20] sm:$0xff]  ;;  %v212_v36 = vld [vmem:[#allocation2 + $0x18] sm:$0xff]  ;;  %v211_v39 = vld [vmem:[#allocation2 + $0x10] sm:$0xff] }
  0x1b   :  { %4516 = vmatprep.subr.mxu0 %v5424_v7  ;;  %4565 = vmatpush3.msra.mxu1 %v214_v34  ;;  %v210_v41 = vld [vmem:[#allocation2 + $0x8] sm:$0xff]  ;;  %v209_v43 = vld [vmem:[#allocation2] sm:$0xff] }
  0x1c   :  { %4517 = vmatpush3.msra.mxu0 %v5424_v7  ;;  %4566 = vmatprep.subr.mxu1 %v213_v35  ;;  %v5644_v9 = vld [vmem:[%s6823_s3] ss:$0 sm:$0xff] }
  0x1d   :  { %4518 = vmatprep.subr.mxu0 %v5431_v10  ;;  %4567 = vmatpush3.msra.mxu1 %v213_v35 }
  0x1e   :  { %4519 = vmatpush3.msra.mxu0 %v5431_v10  ;;  %4592 = vmatprep.subr.mxu1 %v212_v36 }
  0x1f   :  { %4520 = vmatprep.subr.mxu0 %v5438_v11 }
  0x20   :  { %4521 = vmatpush3.msra.mxu0 %v5438_v11 }
  0x21   :  { %4522 = vmatprep.subr.mxu0 %v5445_v12 }
  0x22   :  { %4523 = vmatpush3.msra.mxu0 %v5445_v12 }
  0x23   :  { %4524 = vmatprep.subr.mxu0 %v5452_v13 }
  0x24   :  { %4525 = vmatpush3.msra.mxu0 %v5452_v13 }
  0x25   :  { %4526 = vmatprep.subr.mxu0 %v5459_v14 }
  0x26   :  { %4527 = vmatpush3.msra.mxu0 %v5459_v14 }
  0x27   :  { %4528 = vmatprep.subr.mxu0 %v5466_v15 }
  0x28   :  { %4529 = vmatpush3.msra.mxu0 %v5466_v15 }
  0x29   :  { %4530 = vmatprep.subr.mxu0 %v5473_v16 }
  0x2a   :  { %4531 = vmatpush3.msra.mxu0 %v5473_v16 }
  0x2b   :  { %4532 = vmatprep.subr.mxu0 %v5480_v17 }
  0x2c   :  { %4533 = vmatpush3.msra.mxu0 %v5480_v17 }
  0x2d   :  { %4534 = vmatprep.subr.mxu0 %v5487_v18 }
  0x2e   :  { %4535 = vmatpush3.msra.mxu0 %v5487_v18 }
  0x2f   :  { %4537 = vmatmul.mubr.f32.vlgmr.msra.gmra.mxu0 %v5494_v19 }
  0x30   :  { %4539 = vmatprep.mubr.f32.mxu0 %v5500_v20 }
  0x33   :  { %4540 = vmatmul.mubr.f32.gmra.mxu0 %v5508_v21 }
  0x34   :  { %4542 = vmatprep.mubr.f32.mxu0 %v5513_v22 }
  0x37   :  { %4543 = vmatmul.mubr.f32.gmra.mxu0 %v5520_v23 }
  0x38   :  { %4545 = vmatprep.mubr.f32.mxu0 %v5525_v24 }
  0x3b   :  { %4546 = vmatmul.mubr.f32.gmra.mxu0 %v5532_v25 }
  0x3c   :  { %4548 = vmatprep.mubr.f32.mxu0 %v5537_v26 }
  0x3f   :  { %4549 = vmatmul.mubr.f32.gmra.mxu0 %v5544_v27 }
  0x40   :  { %4551 = vmatprep.mubr.f32.mxu0 %v5549_v28 }
  0x43   :  { %4552 = vmatmul.mubr.f32.gmra.mxu0 %v5556_v29 }
  0x44   :  { %4554 = vmatprep.mubr.f32.mxu0 %v5561_v30 }
  0x47   :  { %4555 = vmatmul.mubr.f32.gmra.mxu0 %v5568_v31 }
  0x48   :  { %4557 = vmatprep.mubr.f32.mxu0 %v5573_v32 }
  0x4b   :  { %4558 = vmatmul.mubr.f32.gmra.mxu0 %v5580_v33 }
  0x4c   :  { %4656 = vmatprep.mubr.f32.mxu0 %v5403_v4 }
  0xef   :  { %v4538_v37 = vpop.f32.mrf.mxu0 }
  0xf1   :  { %v130_v38 = vpop.f32.mrf.mxu0 }
  0xf2   :  { %4568 = vmatprep.mubr.msk.f32.mxu1 %vm218_vm0, %v130_v38 }
  0xf3   :  { %v4541_v40 = vpop.f32.mrf.mxu0  ;;  %4569 = vmatmul.mubr.msk.f32.vlgmr.msra.gmra.mxu1 %vm218_vm0, %v4538_v37 }
  0xf4   :  { %4593 = vmatpush3.msra.mxu1 %v212_v36 }
  0xf5   :  { %v140_v42 = vpop.f32.mrf.mxu0  ;;  %4594 = vmatprep.subr.mxu1 %v211_v39 }
  0xf6   :  { %4571 = vmatprep.mubr.msk.f32.mxu1 %vm218_vm0, %v140_v42  ;;  %4595 = vmatpush3.msra.mxu1 %v211_v39 }
  0xf7   :  { %v4544_v44 = vpop.f32.mrf.mxu0  ;;  %4572 = vmatmul.mubr.msk.f32.gmra.mxu1 %vm218_vm0, %v4541_v40  ;;  %4596 = vmatprep.subr.mxu1 %v210_v41 }
  0xf8   :  { %4597 = vmatpush3.msra.mxu1 %v210_v41 }
  0xf9   :  { %v150_v45 = vpop.f32.mrf.mxu0  ;;  %4598 = vmatprep.subr.mxu1 %v209_v43 }
  0xfa   :  { %4574 = vmatprep.mubr.msk.f32.mxu1 %vm218_vm0, %v150_v45  ;;  %4599 = vmatpush3.msra.mxu1 %v209_v43 }
  0xfb   :  { %v4547_v46 = vpop.f32.mrf.mxu0  ;;  %4575 = vmatmul.mubr.msk.f32.gmra.mxu1 %vm218_vm0, %v4544_v44 }
  0xfd   :  { %v160_v47 = vpop.f32.mrf.mxu0 }
  0xfe   :  { %4577 = vmatprep.mubr.msk.f32.mxu1 %vm218_vm0, %v160_v47 }
  0xff   :  { %v4550_v48 = vpop.f32.mrf.mxu0  ;;  %4578 = vmatmul.mubr.msk.f32.gmra.mxu1 %vm218_vm0, %v4547_v46 }
 0x101   :  { %v170_v49 = vpop.f32.mrf.mxu0 }
 0x102   :  { %4580 = vmatprep.mubr.msk.f32.mxu1 %vm218_vm0, %v170_v49 }
 0x103   :  { %v4553_v50 = vpop.f32.mrf.mxu0  ;;  %4581 = vmatmul.mubr.msk.f32.gmra.mxu1 %vm218_vm0, %v4550_v48 }
 0x105   :  { %v180_v51 = vpop.f32.mrf.mxu0 }
 0x106   :  { %4583 = vmatprep.mubr.msk.f32.mxu1 %vm218_vm0, %v180_v51 }
 0x107   :  { %v4556_v52 = vpop.f32.mrf.mxu0  ;;  %4584 = vmatmul.mubr.msk.f32.gmra.mxu1 %vm218_vm0, %v4553_v50 }
 0x109   :  { %v190_v53 = vpop.f32.mrf.mxu0 }
 0x10a   :  { %4586 = vmatprep.mubr.msk.f32.mxu1 %vm218_vm0, %v190_v53 }
 0x10b   :  { %v4559_v54 = vpop.f32.mrf.mxu0  ;;  %4587 = vmatmul.mubr.msk.f32.gmra.mxu1 %vm218_vm0, %v4556_v52 }
 0x10d   :  { %v200_v55 = vpop.f32.mrf.mxu0 }
 0x10e   :  { %4589 = vmatprep.mubr.msk.f32.mxu1 %vm218_vm0, %v200_v55 }
 0x10f   :  { %4590 = vmatmul.mubr.msk.f32.gmra.mxu1 %vm218_vm0, %v4559_v54 }
 0x110   :  { %4600 = vmatprep.mubr.msk.f32.mxu1 %vm218_vm0, %v5487_v18 }
 0x113   :  { %4601 = vmatmul.mubr.msk.f32.vlgmr.msra.gmra.mxu1 %vm218_vm0, %v5480_v17 }
 0x114   :  { %4603 = vmatprep.mubr.msk.f32.mxu1 %vm218_vm0, %v5473_v16 }
 0x117   :  { %4604 = vmatmul.mubr.msk.f32.gmra.mxu1 %vm218_vm0, %v5466_v15 }
 0x118   :  { %4606 = vmatprep.mubr.msk.f32.mxu1 %vm218_vm0, %v5459_v14 }
 0x11b   :  { %4607 = vmatmul.mubr.msk.f32.gmra.mxu1 %vm218_vm0, %v5452_v13 }
 0x11c   :  { %4609 = vmatprep.mubr.msk.f32.mxu1 %vm218_vm0, %v5445_v12 }
 0x11f   :  { %4610 = vmatmul.mubr.msk.f32.gmra.mxu1 %vm218_vm0, %v5438_v11 }
 0x120   :  { %4612 = vmatprep.mubr.msk.f32.mxu1 %vm218_vm0, %v5431_v10 }
 0x123   :  { %4613 = vmatmul.mubr.msk.f32.gmra.mxu1 %vm218_vm0, %v5424_v7 }
 0x124   :  { %4615 = vmatprep.mubr.msk.f32.mxu1 %vm218_vm0, %v5417_v6 }
 0x127   :  { %4616 = vmatmul.mubr.msk.f32.gmra.mxu1 %vm218_vm0, %v5409_v5 }
 0x128   :  { %4618 = vmatprep.mubr.msk.f32.mxu1 %vm218_vm0, %v5397_v3 }
 0x12b   :  { %4619 = vmatmul.mubr.msk.f32.gmra.mxu1 %vm218_vm0, %v5390_v2 }
 0x12c   :  { %4621 = vmatprep.mubr.msk.f32.mxu1 %vm218_vm0, %v5383_v1 }
 0x12f   :  { %4622 = vmatmul.mubr.msk.f32.gmra.mxu1 %vm218_vm0, %v5378_v0 }
 0x130   :  { %4671 = vmatprep.mubr.f32.mxu1 %v5549_v28 }
 0x1b3   :  { %v4570_v56 = vpop.f32.mrf.mxu1 }
 0x1b5   :  { %v333_v57 = vpop.f32.mrf.mxu1 }
 0x1b7   :  { %v4573_v58 = vpop.f32.mrf.mxu1 }
 0x1b9   :  { %v343_v59 = vpop.f32.mrf.mxu1 }
 0x1bb   :  { %v4576_v60 = vpop.f32.mrf.mxu1 }
 0x1bd   :  { %v353_v61 = vpop.f32.mrf.mxu1 }
 0x1bf   :  { %v4579_v62 = vpop.f32.mrf.mxu1 }
 0x1c1   :  { %v363_v63 = vpop.f32.mrf.mxu1 }
 0x1c3   :  { %v4582_v3 = vpop.f32.mrf.mxu1 }
 0x1c5   :  { %v373_v5 = vpop.f32.mrf.mxu1 }
 0x1c7   :  { %v4585_v6 = vpop.f32.mrf.mxu1 }
 0x1c9   :  { %v383_v2 = vpop.f32.mrf.mxu1 }
 0x1cb   :  { %v5633_v7 = vpop.f32.mrf.mxu1 }
 0x1cd   :  { %v5635_v1 = vpop.f32.mrf.mxu1 }
 0x1cf   :  { %v5637_v8 = vpop.f32.mrf.mxu1 }
 0x1d1   :  { %v5639_v0 = vpop.f32.mrf.mxu1 }
 0x1d3   :  { %v4602_v10 = vpop.f32.mrf.mxu1 }
 0x1d4   :  { %v532_v11 = vadd.f32 %v4602_v10, %v4570_v56 }
 0x1d5   :  { %v526_v12 = vpop.f32.mrf.mxu1 }
 0x1d6   :  { %v610_v13 = vadd.f32 %v5644_v9, %v532_v11  ;;  %v527_v14 = vadd.f32 %v526_v12, %v333_v57 }
 0x1d7   :  { %v4605_v15 = vpop.f32.mrf.mxu1 }
 0x1d8   :  { %v5647_v16 = vmax.f32 %v610_v13, 0.0  ;;  %v609_v17 = vadd.f32 %v5644_v9, %v527_v14  ;;  %v542_v18 = vadd.f32 %v4605_v15, %v4573_v58 }
 0x1d9   :  { %v536_v28 = vpop.f32.mrf.mxu1 }
 0x1da   :  { %642 = vst.msk [vmem:[#allocation5 + $0x10] sm:$0xff] %vm218_vm0, %v5647_v16  ;;  %v5652_v34 = vmax.f32 %v609_v17, 0.0  ;;  %v612_v35 = vadd.f32 %v5644_v9, %v542_v18  ;;  %v537_v36 = vadd.f32 %v536_v28, %v343_v59 }
 0x1db   :  { %v4608_v37 = vpop.f32.mrf.mxu1 }
 0x1dc   :  { %641 = vst.msk [vmem:[#allocation5] sm:$0xff] %vm218_vm0, %v5652_v34  ;;  %v5657_v38 = vmax.f32 %v612_v35, 0.0  ;;  %v611_v39 = vadd.f32 %v5644_v9, %v537_v36  ;;  %v552_v40 = vadd.f32 %v4608_v37, %v4576_v60 }
 0x1dd   :  { %v546_v41 = vpop.f32.mrf.mxu1 }
 0x1de   :  { %644 = vst.msk [vmem:[#allocation5 + $0x30] sm:$0xff] %vm218_vm0, %v5657_v38  ;;  %v5662_v42 = vmax.f32 %v611_v39, 0.0  ;;  %v614_v43 = vadd.f32 %v5644_v9, %v552_v40  ;;  %v547_v44 = vadd.f32 %v546_v41, %v353_v61 }
 0x1df   :  { %v4611_v45 = vpop.f32.mrf.mxu1 }
 0x1e0   :  { %643 = vst.msk [vmem:[#allocation5 + $0x20] sm:$0xff] %vm218_vm0, %v5662_v42  ;;  %v5667_v46 = vmax.f32 %v614_v43, 0.0  ;;  %v613_v47 = vadd.f32 %v5644_v9, %v547_v44  ;;  %v562_v48 = vadd.f32 %v4611_v45, %v4579_v62  ;;  %v658_v45 = vld [vmem:[#allocation2 + $0x48] sm:$0xff] }
 0x1e1   :  { %v556_v49 = vpop.f32.mrf.mxu1 }
 0x1e2   :  { %646 = vst.msk [vmem:[#allocation5 + $0x50] sm:$0xff] %vm218_vm0, %v5667_v46  ;;  %v5672_v50 = vmax.f32 %v613_v47, 0.0  ;;  %v616_v51 = vadd.f32 %v5644_v9, %v562_v48  ;;  %v557_v52 = vadd.f32 %v556_v49, %v363_v63 }
 0x1e3   :  { %v4614_v53 = vpop.f32.mrf.mxu1 }
 0x1e4   :  { %645 = vst.msk [vmem:[#allocation5 + $0x40] sm:$0xff] %vm218_vm0, %v5672_v50  ;;  %v5677_v54 = vmax.f32 %v616_v51, 0.0  ;;  %v615_v55 = vadd.f32 %v5644_v9, %v557_v52  ;;  %v572_v56 = vadd.f32 %v4614_v53, %v4582_v3 }
 0x1e5   :  { %v566_v57 = vpop.f32.mrf.mxu1 }
 0x1e6   :  { %648 = vst.msk [vmem:[#allocation5 + $0x70] sm:$0xff] %vm218_vm0, %v5677_v54  ;;  %v5682_v58 = vmax.f32 %v615_v55, 0.0  ;;  %v618_v59 = vadd.f32 %v5644_v9, %v572_v56  ;;  %v567_v60 = vadd.f32 %v566_v57, %v373_v5  ;;  %v5924_v57 = vld [vmem:[%s6823_s3 + $0x1] ss:$0 sm:$0xff] }
 0x1e7   :  { %v4617_v61 = vpop.f32.mrf.mxu1 }
 0x1e8   :  { %647 = vst.msk [vmem:[#allocation5 + $0x60] sm:$0xff] %vm218_vm0, %v5682_v58  ;;  %v5687_v62 = vmax.f32 %v618_v59, 0.0  ;;  %v617_v63 = vadd.f32 %v5644_v9, %v567_v60  ;;  %v582_v10 = vadd.f32 %v4617_v61, %v4585_v6 }
 0x1e9   :  { %v576_v11 = vpop.f32.mrf.mxu1 }
 0x1ea   :  { %650 = vst.msk [vmem:[#allocation5 + $0x90] sm:$0xff] %vm218_vm0, %v5687_v62  ;;  %v5692_v3 = vmax.f32 %v617_v63, 0.0  ;;  %v620_v12 = vadd.f32 %v5644_v9, %v582_v10  ;;  %v577_v13 = vadd.f32 %v576_v11, %v383_v2 }
 0x1eb   :  { %v4620_v14 = vpop.f32.mrf.mxu1 }
 0x1ec   :  { %649 = vst.msk [vmem:[#allocation5 + $0x80] sm:$0xff] %vm218_vm0, %v5692_v3  ;;  %v5697_v5 = vmax.f32 %v620_v12, 0.0  ;;  %v619_v15 = vadd.f32 %v5644_v9, %v577_v13  ;;  %v592_v17 = vadd.f32 %v4620_v14, %v5633_v7 }
 0x1ed   :  { %v586_v6 = vpop.f32.mrf.mxu1 }
 0x1ee   :  { %652 = vst.msk [vmem:[#allocation5 + $0xb0] sm:$0xff] %vm218_vm0, %v5697_v5  ;;  %v5703_v18 = vmax.f32 %v619_v15, 0.0  ;;  %v622_v28 = vadd.f32 %v5644_v9, %v592_v17  ;;  %v587_v2 = vadd.f32 %v586_v6, %v5635_v1 }
 0x1ef   :  { %v4623_v35 = vpop.f32.mrf.mxu1 }
 0x1f0   :  { %651 = vst.msk [vmem:[#allocation5 + $0xa0] sm:$0xff] %vm218_vm0, %v5703_v18  ;;  %v5709_v36 = vmax.f32 %v622_v28, 0.0  ;;  %v621_v37 = vadd.f32 %v5644_v9, %v587_v2  ;;  %v602_v7 = vadd.f32 %v4623_v35, %v5637_v8 }
 0x1f1   :  { %v596_v39 = vpop.f32.mrf.mxu1 }
 0x1f2   :  { %654 = vst.msk [vmem:[#allocation5 + $0xd0] sm:$0xff] %vm218_vm0, %v5709_v36  ;;  %v5715_v40 = vmax.f32 %v621_v37, 0.0  ;;  %v624_v41 = vadd.f32 %v5644_v9, %v602_v7  ;;  %v597_v1 = vadd.f32 %v596_v39, %v5639_v0  ;;  %2628 = vrot.lane.b32.xlu1 %v5709_v36, %s5338_s1  ;;  %v660_v0 = vld [vmem:[#allocation2 + $0x58] sm:$0xff] }
 0x1f4   :  { %653 = vst.msk [vmem:[#allocation5 + $0xc0] sm:$0xff] %vm218_vm0, %v5715_v40  ;;  %v5723_v43 = vmax.f32 %v624_v41, 0.0  ;;  %v623_v8 = vadd.f32 %v5644_v9, %v597_v1  ;;  %v659_v9 = vld [vmem:[#allocation2 + $0x50] sm:$0xff] }
 0x1f6   :  { %656 = vst.msk [vmem:[#allocation5 + $0xf0] sm:$0xff] %vm218_vm0, %v5723_v43  ;;  %v5728_v44 = vmax.f32 %v623_v8, 0.0  ;;  %2632 = vrot.lane.b32.xlu0 %v5723_v43, %s5338_s1  ;;  %4624 = vmatprep.subr.mxu0 %v5723_v43 }
 0x1f7   :  { %5216 = vmatprep.subr.mxu1 %v5723_v43  ;;  %2626 = vrot.lane.b32.xlu1 %v5715_v40, %s5338_s1 }
 0x1f8   :  { %655 = vst.msk [vmem:[#allocation5 + $0xe0] sm:$0xff] %vm218_vm0, %v5728_v44  ;;  %4625 = vmatpush3.msra.mxu0 %v5723_v43  ;;  %5232 = vmatpush3.msra.mxu1 %v5723_v43 }
 0x1f9   :  { %4626 = vmatprep.subr.mxu0 %v5728_v44  ;;  %5217 = vmatprep.subr.mxu1 %v5728_v44 }
 0x1fa   :  { %4627 = vmatpush3.msra.mxu0 %v5728_v44  ;;  %5233 = vmatpush3.msra.mxu1 %v5728_v44 }
 0x1fb   :  { %2630 = vrot.lane.b32.xlu0 %v5728_v44, %s5338_s1  ;;  %4628 = vmatprep.subr.mxu0 %v5709_v36 }
 0x1fc   :  { %5218 = vmatprep.subr.mxu1 %v5709_v36  ;;  %2622 = vrot.lane.b32.xlu1 %v5703_v18, %s5338_s1 }
 0x1fd   :  { %4629 = vmatpush3.msra.mxu0 %v5709_v36  ;;  %5234 = vmatpush3.msra.mxu1 %v5709_v36 }
 0x1fe   :  { %4630 = vmatprep.subr.mxu0 %v5715_v40  ;;  %5219 = vmatprep.subr.mxu1 %v5715_v40 }
 0x1ff   :  { %4631 = vmatpush3.msra.mxu0 %v5715_v40  ;;  %5235 = vmatpush3.msra.mxu1 %v5715_v40 }
 0x200   :  { %2624 = vrot.lane.b32.xlu0 %v5697_v5, %s5338_s1  ;;  %4632 = vmatprep.subr.mxu0 %v5697_v5 }
 0x201   :  { %5220 = vmatprep.subr.mxu1 %v5697_v5  ;;  %2618 = vrot.lane.b32.xlu1 %v5692_v3, %s5338_s1 }
 0x202   :  { %4633 = vmatpush3.msra.mxu0 %v5697_v5  ;;  %5236 = vmatpush3.msra.mxu1 %v5697_v5 }
 0x203   :  { %4634 = vmatprep.subr.mxu0 %v5703_v18  ;;  %5221 = vmatprep.subr.mxu1 %v5703_v18 }
 0x204   :  { %4635 = vmatpush3.msra.mxu0 %v5703_v18  ;;  %5237 = vmatpush3.msra.mxu1 %v5703_v18 }
 0x205   :  { %2620 = vrot.lane.b32.xlu0 %v5687_v62, %s5338_s1  ;;  %4636 = vmatprep.subr.mxu0 %v5687_v62 }
 0x206   :  { %5222 = vmatprep.subr.mxu1 %v5687_v62  ;;  %2614 = vrot.lane.b32.xlu1 %v5682_v58, %s5338_s1 }
 0x207   :  { %4637 = vmatpush3.msra.mxu0 %v5687_v62  ;;  %5238 = vmatpush3.msra.mxu1 %v5687_v62 }
 0x208   :  { %4638 = vmatprep.subr.mxu0 %v5692_v3  ;;  %5223 = vmatprep.subr.mxu1 %v5692_v3 }
 0x209   :  { %4639 = vmatpush3.msra.mxu0 %v5692_v3  ;;  %5239 = vmatpush3.msra.mxu1 %v5692_v3 }
 0x20a   :  { %2616 = vrot.lane.b32.xlu0 %v5677_v54, %s5338_s1  ;;  %4640 = vmatprep.subr.mxu0 %v5677_v54 }
 0x20b   :  { %5224 = vmatprep.subr.mxu1 %v5677_v54  ;;  %2610 = vrot.lane.b32.xlu1 %v5672_v50, %s5338_s1 }
 0x20c   :  { %4641 = vmatpush3.msra.mxu0 %v5677_v54  ;;  %5240 = vmatpush3.msra.mxu1 %v5677_v54 }
 0x20d   :  { %4642 = vmatprep.subr.mxu0 %v5682_v58  ;;  %5225 = vmatprep.subr.mxu1 %v5682_v58 }
 0x20e   :  { %4643 = vmatpush3.msra.mxu0 %v5682_v58  ;;  %5241 = vmatpush3.msra.mxu1 %v5682_v58 }
 0x20f   :  { %2612 = vrot.lane.b32.xlu0 %v5667_v46, %s5338_s1  ;;  %4644 = vmatprep.subr.mxu0 %v5667_v46 }
 0x210   :  { %5226 = vmatprep.subr.mxu1 %v5667_v46  ;;  %2606 = vrot.lane.b32.xlu1 %v5662_v42, %s5338_s1 }
 0x211   :  { %4645 = vmatpush3.msra.mxu0 %v5667_v46  ;;  %5242 = vmatpush3.msra.mxu1 %v5667_v46 }
 0x212   :  { %4646 = vmatprep.subr.mxu0 %v5672_v50  ;;  %5227 = vmatprep.subr.mxu1 %v5672_v50 }
 0x213   :  { %4647 = vmatpush3.msra.mxu0 %v5672_v50  ;;  %5243 = vmatpush3.msra.mxu1 %v5672_v50 }
 0x214   :  { %2608 = vrot.lane.b32.xlu0 %v5657_v38, %s5338_s1  ;;  %4648 = vmatprep.subr.mxu0 %v5657_v38 }
 0x215   :  { %5228 = vmatprep.subr.mxu1 %v5657_v38  ;;  %2602 = vrot.lane.b32.xlu1 %v5652_v34, %s5338_s1 }
 0x216   :  { %4649 = vmatpush3.msra.mxu0 %v5657_v38  ;;  %5244 = vmatpush3.msra.mxu1 %v5657_v38 }
 0x217   :  { %4650 = vmatprep.subr.mxu0 %v5662_v42  ;;  %5229 = vmatprep.subr.mxu1 %v5662_v42 }
 0x218   :  { %4651 = vmatpush3.msra.mxu0 %v5662_v42  ;;  %5245 = vmatpush3.msra.mxu1 %v5662_v42 }
 0x219   :  { %2604 = vrot.lane.b32.xlu0 %v5647_v16, %s5338_s1  ;;  %4652 = vmatprep.subr.mxu0 %v5647_v16 }
 0x21a   :  { %5230 = vmatprep.subr.mxu1 %v5647_v16  ;;  %2534 = vrot.lane.b32.xlu1 %v5647_v16, %s5339_s6 }
 0x21b   :  { %4653 = vmatpush3.msra.mxu0 %v5647_v16  ;;  %5246 = vmatpush3.msra.mxu1 %v5647_v16 }
 0x21c   :  { %4654 = vmatprep.subr.mxu0 %v5652_v34  ;;  %5231 = vmatprep.subr.mxu1 %v5652_v34 }
 0x21d   :  { %4655 = vmatpush3.msra.mxu0 %v5652_v34  ;;  %5247 = vmatpush3.msra.mxu1 %v5652_v34 }
 0x21e   :  { %2532 = vrot.lane.b32.xlu0 %v5652_v34, %s5339_s6  ;;  %2538 = vrot.lane.b32.xlu1 %v5657_v38, %s5339_s6 }
 0x21f   :  { %4657 = vmatmul.mubr.f32.vlgmr.msra.gmra.mxu0 %v5494_v19  ;;  %4712 = vmatprep.subr.mxu0 %v660_v0  ;;  %v657_v19 = vld [vmem:[#allocation2 + $0x40] sm:$0xff] }
 0x220   :  { %4659 = vmatprep.mubr.f32.mxu0 %v5500_v20  ;;  %4713 = vmatpush3.msra.mxu0 %v660_v0  ;;  %v664_v20 = vld [vmem:[#allocation2 + $0x78] sm:$0xff] }
 0x221   :  { %4714 = vmatprep.subr.mxu0 %v659_v9  ;;  %4672 = vmatmul.mubr.f32.vlgmr.msra.gmra.mxu1 %v5556_v29 }
 0x222   :  { %2536 = vrot.lane.b32.xlu0 %v5662_v42, %s5339_s6  ;;  %2542 = vrot.lane.b32.xlu1 %v5667_v46, %s5339_s6 }
 0x223   :  { %4660 = vmatmul.mubr.f32.gmra.mxu0 %v5508_v21  ;;  %4674 = vmatprep.mubr.f32.mxu1 %v5561_v30  ;;  %v663_v21 = vld [vmem:[#allocation2 + $0x70] sm:$0xff] }
 0x224   :  { %4662 = vmatprep.mubr.f32.mxu0 %v5513_v22  ;;  %4715 = vmatpush3.msra.mxu0 %v659_v9  ;;  %v662_v22 = vld [vmem:[#allocation2 + $0x68] sm:$0xff] }
 0x225   :  { %4716 = vmatprep.subr.mxu0 %v658_v45  ;;  %4675 = vmatmul.mubr.f32.gmra.mxu1 %v5568_v31 }
 0x226   :  { %2540 = vrot.lane.b32.xlu0 %v5672_v50, %s5339_s6  ;;  %2546 = vrot.lane.b32.xlu1 %v5677_v54, %s5339_s6 }
 0x227   :  { %4663 = vmatmul.mubr.f32.gmra.mxu0 %v5520_v23  ;;  %4677 = vmatprep.mubr.f32.mxu1 %v5573_v32  ;;  %v661_v23 = vld [vmem:[#allocation2 + $0x60] sm:$0xff] }
 0x228   :  { %4665 = vmatprep.mubr.f32.mxu0 %v5525_v24  ;;  %4717 = vmatpush3.msra.mxu0 %v658_v45 }
 0x229   :  { %4718 = vmatprep.subr.mxu0 %v657_v19  ;;  %4678 = vmatmul.mubr.f32.gmra.mxu1 %v5580_v33 }
 0x22a   :  { %2544 = vrot.lane.b32.xlu0 %v5682_v58, %s5339_s6  ;;  %2550 = vrot.lane.b32.xlu1 %v5687_v62, %s5339_s6 }
 0x22b   :  { %4666 = vmatmul.mubr.f32.gmra.mxu0 %v5532_v25  ;;  %4680 = vmatprep.subr.mxu1 %v664_v20 }
 0x22c   :  { %4668 = vmatprep.mubr.f32.mxu0 %v5537_v26  ;;  %4719 = vmatpush3.msra.mxu0 %v657_v19 }
 0x22d   :  { %4681 = vmatpush3.msra.mxu1 %v664_v20 }
 0x22e   :  { %2548 = vrot.lane.b32.xlu0 %v5692_v3, %s5339_s6  ;;  %2554 = vrot.lane.b32.xlu1 %v5697_v5, %s5339_s6 }
 0x22f   :  { %4669 = vmatmul.mubr.f32.gmra.mxu0 %v5544_v27  ;;  %4682 = vmatprep.subr.mxu1 %v663_v21 }
 0x230   :  { %4720 = vmatprep.mubr.msk.f32.mxu0 %vm218_vm0, %v5652_v34  ;;  %4683 = vmatpush3.msra.mxu1 %v663_v21 }
 0x231   :  { %4684 = vmatprep.subr.mxu1 %v662_v22 }
 0x232   :  { %2552 = vrot.lane.b32.xlu0 %v5703_v18, %s5339_s6  ;;  %2558 = vrot.lane.b32.xlu1 %v5709_v36, %s5339_s6 }
 0x233   :  { %4721 = vmatmul.mubr.msk.f32.vlgmr.msra.gmra.mxu0 %vm218_vm0, %v5647_v16  ;;  %4685 = vmatpush3.msra.mxu1 %v662_v22 }
 0x234   :  { %4723 = vmatprep.mubr.msk.f32.mxu0 %vm218_vm0, %v5662_v42  ;;  %4686 = vmatprep.subr.mxu1 %v661_v23 }
 0x235   :  { %4687 = vmatpush3.msra.mxu1 %v661_v23 }
 0x236   :  { %2556 = vrot.lane.b32.xlu0 %v5715_v40, %s5339_s6  ;;  %2562 = vrot.lane.b32.xlu1 %v5723_v43, %s5339_s6 }
 0x237   :  { %4724 = vmatmul.mubr.msk.f32.gmra.mxu0 %vm218_vm0, %v5657_v38 }
 0x238   :  { %4726 = vmatprep.mubr.msk.f32.mxu0 %vm218_vm0, %v5672_v50 }
 0x23a   :  { %2560 = vrot.lane.b32.xlu0 %v5728_v44, %s5339_s6 }
 0x23b   :  { %4727 = vmatmul.mubr.msk.f32.gmra.mxu0 %vm218_vm0, %v5667_v46 }
 0x23c   :  { %4729 = vmatprep.mubr.msk.f32.mxu0 %vm218_vm0, %v5682_v58 }
 0x23f   :  { %4730 = vmatmul.mubr.msk.f32.gmra.mxu0 %vm218_vm0, %v5677_v54 }
 0x240   :  { %4732 = vmatprep.mubr.msk.f32.mxu0 %vm218_vm0, %v5692_v3 }
 0x243   :  { %4733 = vmatmul.mubr.msk.f32.gmra.mxu0 %vm218_vm0, %v5687_v62 }
 0x244   :  { %4735 = vmatprep.mubr.msk.f32.mxu0 %vm218_vm0, %v5703_v18 }
 0x247   :  { %4736 = vmatmul.mubr.msk.f32.gmra.mxu0 %vm218_vm0, %v5697_v5 }
 0x248   :  { %4738 = vmatprep.mubr.msk.f32.mxu0 %vm218_vm0, %v5715_v40 }
 0x24b   :  { %4739 = vmatmul.mubr.msk.f32.gmra.mxu0 %vm218_vm0, %v5709_v36 }
 0x24c   :  { %4741 = vmatprep.mubr.msk.f32.mxu0 %vm218_vm0, %v5728_v44 }
 0x24f   :  { %4742 = vmatmul.mubr.msk.f32.gmra.mxu0 %vm218_vm0, %v5723_v43 }
 0x2df   :  { %v4658_v24 = vpop.f32.mrf.mxu0 }
 0x2e1   :  { %v732_v25 = vpop.f32.mrf.mxu0  ;;  %v4673_v29 = vpop.f32.mrf.mxu1 }
 0x2e2   :  { %4688 = vmatprep.mubr.msk.f32.mxu1 %vm218_vm0, %v732_v25 }
 0x2e3   :  { %v4661_v26 = vpop.f32.mrf.mxu0  ;;  %4689 = vmatmul.mubr.msk.f32.vlgmr.msra.gmra.mxu1 %vm218_vm0, %v4658_v24  ;;  %v782_v32 = vpop.f32.mrf.mxu1 }
 0x2e5   :  { %v742_v27 = vpop.f32.mrf.mxu0  ;;  %v4676_v34 = vpop.f32.mrf.mxu1 }
 0x2e6   :  { %4691 = vmatprep.mubr.msk.f32.mxu1 %vm218_vm0, %v742_v27 }
 0x2e7   :  { %v4664_v30 = vpop.f32.mrf.mxu0  ;;  %4692 = vmatmul.mubr.msk.f32.gmra.mxu1 %vm218_vm0, %v4661_v26  ;;  %v792_v46 = vpop.f32.mrf.mxu1 }
 0x2e9   :  { %v752_v31 = vpop.f32.mrf.mxu0  ;;  %v4679_v47 = vpop.f32.mrf.mxu1 }
 0x2ea   :  { %4694 = vmatprep.mubr.msk.f32.mxu1 %vm218_vm0, %v752_v31 }
 0x2eb   :  { %v4667_v33 = vpop.f32.mrf.mxu0  ;;  %4695 = vmatmul.mubr.msk.f32.gmra.mxu1 %vm218_vm0, %v4664_v30  ;;  %v802_v48 = vpop.f32.mrf.mxu1 }
 0x2ed   :  { %v762_v16 = vpop.f32.mrf.mxu0 }
 0x2ee   :  { %4697 = vmatprep.mubr.msk.f32.mxu1 %vm218_vm0, %v762_v16 }
 0x2ef   :  { %v4670_v38 = vpop.f32.mrf.mxu0  ;;  %4698 = vmatmul.mubr.msk.f32.gmra.mxu1 %vm218_vm0, %v4667_v33 }
 0x2f1   :  { %v772_v42 = vpop.f32.mrf.mxu0 }
 0x2f2   :  { %4700 = vmatprep.mubr.msk.f32.mxu1 %vm218_vm0, %v772_v42 }
 0x2f3   :  { %4701 = vmatmul.mubr.msk.f32.gmra.mxu1 %vm218_vm0, %v4670_v38  ;;  %v4722_v49 = vpop.f32.mrf.mxu0 }
 0x2f4   :  { %4703 = vmatprep.mubr.msk.f32.mxu1 %vm218_vm0, %v782_v32 }
 0x2f5   :  { %v1118_v50 = vpop.f32.mrf.mxu0 }
 0x2f7   :  { %4704 = vmatmul.mubr.msk.f32.gmra.mxu1 %vm218_vm0, %v4673_v29  ;;  %v4725_v51 = vpop.f32.mrf.mxu0 }
 0x2f8   :  { %4706 = vmatprep.mubr.msk.f32.mxu1 %vm218_vm0, %v792_v46  ;;  %v1321_v46 = vld [vmem:[#allocation2 + $0xb8] sm:$0xff] }
 0x2f9   :  { %v1128_v52 = vpop.f32.mrf.mxu0  ;;  %4800 = vmatprep.subr.mxu0 %v1321_v46 }
 0x2fa   :  { %4801 = vmatpush3.msra.mxu0 %v1321_v46 }
 0x2fb   :  { %4707 = vmatmul.mubr.msk.f32.gmra.mxu1 %vm218_vm0, %v4676_v34  ;;  %v4728_v53 = vpop.f32.mrf.mxu0 }
 0x2fc   :  { %4709 = vmatprep.mubr.msk.f32.mxu1 %vm218_vm0, %v802_v48 }
 0x2fd   :  { %v1138_v54 = vpop.f32.mrf.mxu0 }
 0x2ff   :  { %4710 = vmatmul.mubr.msk.f32.gmra.mxu1 %vm218_vm0, %v4679_v47  ;;  %v4731_v55 = vpop.f32.mrf.mxu0  ;;  %v1320_v47 = vld [vmem:[#allocation2 + $0xb0] sm:$0xff] }
 0x300   :  { %4776 = vmatprep.mubr.f32.mxu1 %v5403_v4  ;;  %4802 = vmatprep.subr.mxu0 %v1320_v47 }
 0x301   :  { %v1148_v56 = vpop.f32.mrf.mxu0  ;;  %4803 = vmatpush3.msra.mxu0 %v1320_v47 }
 0x303   :  { %v4734_v60 = vpop.f32.mrf.mxu0 }
 0x305   :  { %v1158_v12 = vpop.f32.mrf.mxu0 }
 0x307   :  { %v4737_v2 = vpop.f32.mrf.mxu0 }
 0x309   :  { %v1168_v43 = vpop.f32.mrf.mxu0 }
 0x30b   :  { %v4740_v22 = vpop.f32.mrf.mxu0 }
 0x30d   :  { %v1178_v32 = vpop.f32.mrf.mxu0 }
 0x3a3   :  { %v4690_v58 = vpop.f32.mrf.mxu1 }
 0x3a4   :  { %v1124_v59 = vadd.f32 %v4722_v49, %v4690_v58 }
 0x3a5   :  { %v925_v61 = vpop.f32.mrf.mxu1 }
 0x3a6   :  { %v1202_v62 = vadd.f32 %v5924_v57, %v1124_v59  ;;  %v1119_v4 = vadd.f32 %v1118_v50, %v925_v61  ;;  %v5987_v61 = vpop.permute.xlu0 %2632 }
 0x3a7   :  { %v4693_v63 = vpop.f32.mrf.mxu1 }
 0x3a8   :  { %v5927_v10 = vmax.f32 %v1202_v62, 0.0  ;;  %v1201_v11 = vadd.f32 %v5924_v57, %v1119_v4  ;;  %v1134_v3 = vadd.f32 %v4725_v51, %v4693_v63  ;;  %v4743_v51 = vpop.f32.mrf.mxu0 }
 0x3a9   :  { %v935_v13 = vpop.f32.mrf.mxu1 }
 0x3aa   :  { %v5930_v14 = vmax.f32 %v1201_v11, 0.0  ;;  %v1204_v5 = vadd.f32 %v5924_v57, %v1134_v3  ;;  %v1129_v15 = vadd.f32 %v1128_v52, %v935_v13  ;;  %1251 = vrot.lane.b32.xlu1 %v5927_v10, %s5340_s9  ;;  %v1188_v11 = vpop.f32.mrf.mxu0 }
 0x3ab   :  { %v4696_v17 = vpop.f32.mrf.mxu1 }
 0x3ac   :  { %v5935_v6 = vmax.f32 %v1204_v5, 0.0  ;;  %v1203_v18 = vadd.f32 %v5924_v57, %v1129_v15  ;;  %v1144_v28 = vadd.f32 %v4728_v53, %v4696_v17  ;;  %1249 = vrot.lane.b32.xlu0 %v5930_v14, %s5340_s9  ;;  %v1319_v53 = vld [vmem:[#allocation2 + $0xa8] sm:$0xff] }
 0x3ad   :  { %v945_v35 = vpop.f32.mrf.mxu1  ;;  %4804 = vmatprep.subr.mxu0 %v1319_v53 }
 0x3ae   :  { %v5940_v36 = vmax.f32 %v1203_v18, 0.0  ;;  %v1206_v37 = vadd.f32 %v5924_v57, %v1144_v28  ;;  %v1139_v7 = vadd.f32 %v1138_v54, %v945_v35  ;;  %1255 = vrot.lane.b32.xlu1 %v5935_v6, %s5340_s9  ;;  %v5980_v54 = vpop.permute.xlu1 %2628  ;;  %4805 = vmatpush3.msra.mxu0 %v1319_v53  ;;  %v6006_v28 = vpop.permute.xlu0 %2630  ;;  %v6149_v53 = vld [vmem:[%s6820_s0 + $0x60] sm:$0xff] }
 0x3af   :  { %v4699_v39 = vpop.f32.mrf.mxu1 }
 0x3b0   :  { %v5945_v40 = vmax.f32 %v1206_v37, 0.0  ;;  %v1205_v41 = vadd.f32 %v5924_v57, %v1139_v7  ;;  %v1154_v1 = vadd.f32 %v4731_v55, %v4699_v39  ;;  %1253 = vrot.lane.b32.xlu0 %v5940_v36, %s5340_s9 }
 0x3b1   :  { %v955_v8 = vpop.f32.mrf.mxu1 }
 0x3b2   :  { %v5950_v44 = vmax.f32 %v1205_v41, 0.0  ;;  %v1208_v0 = vadd.f32 %v5924_v57, %v1154_v1  ;;  %v1149_v9 = vadd.f32 %v1148_v56, %v955_v8  ;;  %1259 = vrot.lane.b32.xlu1 %v5945_v40, %s5340_s9  ;;  %v5999_v15 = vpop.permute.xlu1 %2626  ;;  %v6022_v35 = vpop.permute.xlu0 %2624 }
 0x3b3   :  { %v4702_v45 = vpop.f32.mrf.mxu1 }
 0x3b4   :  { %v5955_v19 = vmax.f32 %v1208_v0, 0.0  ;;  %v1207_v20 = vadd.f32 %v5924_v57, %v1149_v9  ;;  %v1164_v21 = vadd.f32 %v4734_v60, %v4702_v45  ;;  %1257 = vrot.lane.b32.xlu0 %v5950_v44, %s5340_s9  ;;  %v1318_v60 = vld [vmem:[#allocation2 + $0xa0] sm:$0xff]  ;;  %v1317_v0 = vld [vmem:[#allocation2 + $0x98] sm:$0xff]  ;;  %v1316_v45 = vld [vmem:[#allocation2 + $0x90] sm:$0xff] }
 0x3b5   :  { %v965_v23 = vpop.f32.mrf.mxu1  ;;  %4806 = vmatprep.subr.mxu0 %v1318_v60 }
 0x3b6   :  { %v5960_v24 = vmax.f32 %v1207_v20, 0.0  ;;  %v1210_v25 = vadd.f32 %v5924_v57, %v1164_v21  ;;  %v1159_v26 = vadd.f32 %v1158_v12, %v965_v23  ;;  %1263 = vrot.lane.b32.xlu1 %v5955_v19, %s5340_s9  ;;  %4807 = vmatpush3.msra.mxu0 %v1318_v60  ;;  %v6032_v7 = vpop.permute.xlu0 %2620  ;;  %v6069_v20 = vld [vmem:[%s6820_s0 + $0x8] sm:$0xff]  ;;  %v6075_v21 = vld [vmem:[%s6820_s0 + $0x10] sm:$0xff] }
 0x3b7   :  { %v4705_v27 = vpop.f32.mrf.mxu1 }
 0x3b8   :  { %v5965_v29 = vmax.f32 %v1210_v25, 0.0  ;;  %v1209_v30 = vadd.f32 %v5924_v57, %v1159_v26  ;;  %v1174_v31 = vadd.f32 %v4737_v2, %v4705_v27  ;;  %1261 = vrot.lane.b32.xlu0 %v5960_v24, %s5340_s9  ;;  %v1314_v25 = vld [vmem:[#allocation2 + $0x80] sm:$0xff]  ;;  %v6085_v27 = vld [vmem:[%s6820_s0 + $0x18] sm:$0xff] }
 0x3b9   :  { %v975_v33 = vpop.f32.mrf.mxu1 }
 0x3ba   :  { %v5970_v16 = vmax.f32 %v1209_v30, 0.0  ;;  %v1212_v34 = vadd.f32 %v5924_v57, %v1174_v31  ;;  %v1169_v38 = vadd.f32 %v1168_v43, %v975_v33  ;;  %1267 = vrot.lane.b32.xlu1 %v5965_v29, %s5340_s9  ;;  %v6042_v41 = vpop.permute.xlu0 %2616  ;;  %v6091_v30 = vld [vmem:[%s6820_s0 + $0x20] sm:$0xff]  ;;  %v6105_v33 = vld [vmem:[%s6820_s0 + $0x30] sm:$0xff] }
 0x3bb   :  { %v4708_v42 = vpop.f32.mrf.mxu1 }
 0x3bc   :  { %v5975_v48 = vmax.f32 %v1212_v34, 0.0  ;;  %v1211_v49 = vadd.f32 %v5924_v57, %v1169_v38  ;;  %v1184_v50 = vadd.f32 %v4740_v22, %v4708_v42  ;;  %1265 = vrot.lane.b32.xlu0 %v5970_v16, %s5340_s9  ;;  %v1315_v22 = vld [vmem:[#allocation2 + $0x88] sm:$0xff]  ;;  %v6113_v38 = vld [vmem:[%s6820_s0 + $0x38] sm:$0xff]  ;;  %v6119_v42 = vld [vmem:[%s6820_s0 + $0x40] sm:$0xff] }
 0x3bd   :  { %v985_v52 = vpop.f32.mrf.mxu1 }
 0x3be   :  { %v5982_v55 = vmax.f32 %v1211_v49, 0.0  ;;  %v1214_v56 = vadd.f32 %v5924_v57, %v1184_v50  ;;  %v1179_v58 = vadd.f32 %v1178_v32, %v985_v52  ;;  %1271 = vrot.lane.b32.xlu1 %v5975_v48, %s5340_s9  ;;  %v6052_v43 = vpop.permute.xlu0 %2612  ;;  %v6099_v32 = vld [vmem:[%s6820_s0 + $0x28] sm:$0xff]  ;;  %v6135_v50 = vld [vmem:[%s6820_s0 + $0x50] sm:$0xff]  ;;  %v6143_v52 = vld [vmem:[%s6820_s0 + $0x58] sm:$0xff] }
 0x3bf   :  { %v4711_v59 = vpop.f32.mrf.mxu1  ;;  %v6129_v49 = vld [vmem:[%s6820_s0 + $0x48] sm:$0xff] }
 0x3c0   :  { %v5989_v62 = vmax.f32 %v1214_v56, 0.0  ;;  %v1213_v4 = vadd.f32 %v5924_v57, %v1179_v58  ;;  %v1194_v63 = vadd.f32 %v4743_v51, %v4711_v59  ;;  %1269 = vrot.lane.b32.xlu0 %v5982_v55, %s5340_s9  ;;  %v6157_v58 = vld [vmem:[%s6820_s0 + $0x68] sm:$0xff]  ;;  %v6163_v59 = vld [vmem:[%s6820_s0 + $0x70] sm:$0xff] }
 0x3c1   :  { %v995_v3 = vpop.f32.mrf.mxu1 }
 0x3c2   :  { %v5994_v12 = vmax.f32 %v1213_v4, 0.0  ;;  %v1216_v13 = vadd.f32 %v5924_v57, %v1194_v63  ;;  %v1189_v5 = vadd.f32 %v1188_v11, %v995_v3  ;;  %1275 = vrot.lane.b32.xlu1 %v5989_v62, %s5340_s9  ;;  %v6062_v9 = vpop.permute.xlu0 %2608  ;;  %v6173_v63 = vld [vmem:[%s6820_s0 + $0x78] sm:$0xff] }
 0x3c4   :  { %v6001_v17 = vmax.f32 %v1216_v13, 0.0  ;;  %v1215_v18 = vadd.f32 %v5924_v57, %v1189_v5  ;;  %1273 = vrot.lane.b32.xlu0 %v5994_v12, %s5340_s9  ;;  %v6018_v57 = vpop.permute.xlu1 %2622 }
 0x3c6   :  { %v6008_v2 = vmax.f32 %v1215_v18, 0.0  ;;  %1279 = vrot.lane.b32.xlu1 %v6001_v17, %s5340_s9  ;;  %4744 = vmatprep.subr.mxu1 %v6001_v17  ;;  %v6080_v26 = vpop.permute.xlu0 %2604 }
 0x3c7   :  { %4745 = vmatpush3.msra.mxu1 %v6001_v17 }
 0x3c8   :  { %1277 = vrot.lane.b32.xlu0 %v6008_v2, %s5340_s9  ;;  %4746 = vmatprep.subr.mxu1 %v6008_v2  ;;  %v6028_v37 = vpop.permute.xlu1 %2618 }
 0x3c9   :  { %4747 = vmatpush3.msra.mxu1 %v6008_v2 }
 0x3ca   :  { %4748 = vmatprep.subr.mxu1 %v5989_v62  ;;  %v6108_v34 = vpop.permute.xlu0 %2532 }
 0x3cb   :  { %4749 = vmatpush3.msra.mxu1 %v5989_v62 }
 0x3cc   :  { %4750 = vmatprep.subr.mxu1 %v5994_v12  ;;  %v6038_v39 = vpop.permute.xlu1 %2614 }
 0x3cd   :  { %4751 = vmatpush3.msra.mxu1 %v5994_v12 }
 0x3ce   :  { %4752 = vmatprep.subr.mxu1 %v5975_v48  ;;  %v6124_v47 = vpop.permute.xlu0 %2536 }
 0x3cf   :  { %4753 = vmatpush3.msra.mxu1 %v5975_v48 }
 0x3d0   :  { %4754 = vmatprep.subr.mxu1 %v5982_v55  ;;  %v6048_v1 = vpop.permute.xlu1 %2610 }
 0x3d1   :  { %4755 = vmatpush3.msra.mxu1 %v5982_v55 }
 0x3d2   :  { %4756 = vmatprep.subr.mxu1 %v5965_v29  ;;  %v6152_v56 = vpop.permute.xlu0 %2540 }
 0x3d3   :  { %4757 = vmatpush3.msra.mxu1 %v5965_v29  ;;  %6825 = vst [vmem:[#allocation8_spill] sm:$0xff] %v6152_v56 }
 0x3d4   :  { %4758 = vmatprep.subr.mxu1 %v5970_v16  ;;  %v6058_v8 = vpop.permute.xlu1 %2606 }
 0x3d5   :  { %4759 = vmatpush3.msra.mxu1 %v5970_v16 }
 0x3d6   :  { %4760 = vmatprep.subr.mxu1 %v5955_v19  ;;  %v6168_v4 = vpop.permute.xlu0 %2544 }
 0x3d7   :  { %4761 = vmatpush3.msra.mxu1 %v5955_v19  ;;  %6827 = vst [vmem:[#allocation10_spill] sm:$0xff] %v6168_v4 }
 0x3d8   :  { %4762 = vmatprep.subr.mxu1 %v5960_v24  ;;  %v6078_v23 = vpop.permute.xlu1 %2602 }
 0x3d9   :  { %4763 = vmatpush3.msra.mxu1 %v5960_v24 }
 0x3da   :  { %4764 = vmatprep.subr.mxu1 %v5945_v40  ;;  %v6184_v3 = vpop.permute.xlu0 %2548 }
 0x3db   :  { %4765 = vmatpush3.msra.mxu1 %v5945_v40  ;;  %6829 = vst [vmem:[#allocation12_spill] sm:$0xff] %v6184_v3 }
 0x3dc   :  { %4766 = vmatprep.subr.mxu1 %v5950_v44  ;;  %v6094_v31 = vpop.permute.xlu1 %2534 }
 0x3dd   :  { %4767 = vmatpush3.msra.mxu1 %v5950_v44 }
 0x3de   :  { %4768 = vmatprep.subr.mxu1 %v5935_v6  ;;  %v6192_v5 = vpop.permute.xlu0 %2552 }
 0x3df   :  { %4769 = vmatpush3.msra.mxu1 %v5935_v6  ;;  %6831 = vst [vmem:[#allocation14_spill] sm:$0xff] %v6192_v5 }
 0x3e0   :  { %4770 = vmatprep.subr.mxu1 %v5940_v36  ;;  %v6122_v46 = vpop.permute.xlu1 %2538 }
 0x3e1   :  { %4771 = vmatpush3.msra.mxu1 %v5940_v36 }
 0x3e2   :  { %4772 = vmatprep.subr.mxu1 %v5927_v10 }
 0x3e3   :  { %4773 = vmatpush3.msra.mxu1 %v5927_v10 }
 0x3e4   :  { %4774 = vmatprep.subr.mxu1 %v5930_v14  ;;  %v6138_v51 = vpop.permute.xlu1 %2542 }
 0x3e5   :  { %4775 = vmatpush3.msra.mxu1 %v5930_v14 }
 0x3e6   :  { %4777 = vmatmul.mubr.f32.vlgmr.msra.gmra.mxu1 %v6069_v20  ;;  %4832 = vmatprep.subr.mxu1 %v1317_v0 }
 0x3e7   :  { %4779 = vmatprep.mubr.f32.mxu1 %v6075_v21  ;;  %4833 = vmatpush3.msra.mxu1 %v1317_v0 }
 0x3e8   :  { %4834 = vmatprep.subr.mxu1 %v1316_v45  ;;  %v6166_v60 = vpop.permute.xlu1 %2546 }
 0x3e9   :  { %4835 = vmatpush3.msra.mxu1 %v1316_v45  ;;  %6826 = vst [vmem:[#allocation9_spill] sm:$0xff] %v6166_v60 }
 0x3ea   :  { %4780 = vmatmul.mubr.f32.gmra.mxu1 %v6085_v27  ;;  %4836 = vmatprep.subr.mxu1 %v1315_v22 }
 0x3eb   :  { %4782 = vmatprep.mubr.f32.mxu1 %v6091_v30  ;;  %4837 = vmatpush3.msra.mxu1 %v1315_v22 }
 0x3ec   :  { %4838 = vmatprep.subr.mxu1 %v1314_v25  ;;  %v6178_v11 = vpop.permute.xlu1 %2550 }
 0x3ed   :  { %4839 = vmatpush3.msra.mxu1 %v1314_v25  ;;  %6828 = vst [vmem:[#allocation11_spill] sm:$0xff] %v6178_v11 }
 0x3ee   :  { %4783 = vmatmul.mubr.f32.gmra.mxu1 %v6099_v32 }
 0x3ef   :  { %4785 = vmatprep.mubr.f32.mxu1 %v6105_v33 }
 0x3f0   :  { %v6190_v13 = vpop.permute.xlu1 %2554 }
 0x3f1   :  { %6830 = vst [vmem:[#allocation13_spill] sm:$0xff] %v6190_v13 }
 0x3f2   :  { %4786 = vmatmul.mubr.f32.gmra.mxu1 %v6113_v38 }
 0x3f3   :  { %4788 = vmatprep.mubr.f32.mxu1 %v6119_v42 }
 0x3f6   :  { %4789 = vmatmul.mubr.f32.gmra.mxu1 %v6129_v49 }
 0x3f7   :  { %4791 = vmatprep.mubr.f32.mxu1 %v6135_v50 }
 0x3fa   :  { %4792 = vmatmul.mubr.f32.gmra.mxu1 %v6143_v52 }
 0x3fb   :  { %4794 = vmatprep.mubr.f32.mxu1 %v6149_v53 }
 0x3fe   :  { %4795 = vmatmul.mubr.f32.gmra.mxu1 %v6157_v58 }
 0x3ff   :  { %4797 = vmatprep.mubr.f32.mxu1 %v6163_v59 }
 0x402   :  { %4798 = vmatmul.mubr.f32.gmra.mxu1 %v6173_v63 }
 0x403   :  { %4840 = vmatprep.mubr.msk.f32.mxu1 %vm218_vm0, %v5930_v14  ;;  %v6204_v14 = vpop.permute.xlu0 %2556 }
 0x404   :  { %6833 = vst [vmem:[#allocation16_spill] sm:$0xff] %v6204_v14 }
 0x406   :  { %4841 = vmatmul.mubr.msk.f32.vlgmr.msra.gmra.mxu1 %vm218_vm0, %v5927_v10  ;;  %v6198_v10 = vpop.permute.xlu1 %2558 }
 0x407   :  { %4843 = vmatprep.mubr.msk.f32.mxu1 %vm218_vm0, %v5940_v36  ;;  %6832 = vst [vmem:[#allocation15_spill] sm:$0xff] %v6198_v10  ;;  %v6212_v36 = vpop.permute.xlu0 %2560 }
 0x408   :  { %6835 = vst [vmem:[#allocation18_spill] sm:$0xff] %v6212_v36 }
 0x40a   :  { %4844 = vmatmul.mubr.msk.f32.gmra.mxu1 %vm218_vm0, %v5935_v6  ;;  %v6210_v6 = vpop.permute.xlu1 %2562 }
 0x40b   :  { %4846 = vmatprep.mubr.msk.f32.mxu1 %vm218_vm0, %v5950_v44  ;;  %6834 = vst [vmem:[#allocation17_spill] sm:$0xff] %v6210_v6 }
 0x40e   :  { %4847 = vmatmul.mubr.msk.f32.gmra.mxu1 %vm218_vm0, %v5945_v40 }
 0x40f   :  { %4849 = vmatprep.mubr.msk.f32.mxu1 %vm218_vm0, %v5960_v24 }
 0x412   :  { %4850 = vmatmul.mubr.msk.f32.gmra.mxu1 %vm218_vm0, %v5955_v19 }
 0x413   :  { %4852 = vmatprep.mubr.msk.f32.mxu1 %vm218_vm0, %v5970_v16 }
 0x416   :  { %4853 = vmatmul.mubr.msk.f32.gmra.mxu1 %vm218_vm0, %v5965_v29  ;;  %v6231_v29 = vld [vmem:[%s6820_s0] sm:$0xff] }
 0x417   :  { %4855 = vmatprep.mubr.msk.f32.mxu1 %vm218_vm0, %v5982_v55 }
 0x41a   :  { %4856 = vmatmul.mubr.msk.f32.gmra.mxu1 %vm218_vm0, %v5975_v48 }
 0x41b   :  { %4858 = vmatprep.mubr.msk.f32.mxu1 %vm218_vm0, %v5994_v12 }
 0x41c   :  { %v1252_v40 = vpop.permute.xlu1 %1251 }
 0x41d   :  { %1299 = vst.msk [vmem:[#allocation5 + $0x10] sm:$0xff] %vm1297_vm1, %v1252_v40  ;;  %v1962_v40 = vld [vmem:[#allocation2 + $0xf8] sm:$0xff] }
 0x41e   :  { %v1250_v44 = vpop.permute.xlu0 %1249  ;;  %4859 = vmatmul.mubr.msk.f32.gmra.mxu1 %vm218_vm0, %v5989_v62  ;;  %4864 = vmatprep.subr.mxu0 %v1962_v40 }
 0x41f   :  { %1298 = vst.msk [vmem:[#allocation5] sm:$0xff] %vm1297_vm1, %v1250_v44  ;;  %4861 = vmatprep.mubr.msk.f32.mxu1 %vm218_vm0, %v6008_v2 }
 0x420   :  { %v1256_v19 = vpop.permute.xlu1 %1255 }
 0x421   :  { %1301 = vst.msk [vmem:[#allocation5 + $0x30] sm:$0xff] %vm1297_vm1, %v1256_v19 }
 0x422   :  { %v1254_v24 = vpop.permute.xlu0 %1253  ;;  %4862 = vmatmul.mubr.msk.f32.gmra.mxu1 %vm218_vm0, %v6001_v17 }
 0x423   :  { %1300 = vst.msk [vmem:[#allocation5 + $0x20] sm:$0xff] %vm1297_vm1, %v1254_v24  ;;  %4928 = vmatprep.mubr.f32.mxu1 %v6231_v29  ;;  %v1961_v24 = vld [vmem:[#allocation2 + $0xf0] sm:$0xff] }
 0x424   :  { %v1260_v16 = vpop.permute.xlu1 %1259 }
 0x425   :  { %1303 = vst.msk [vmem:[#allocation5 + $0x50] sm:$0xff] %vm1297_vm1, %v1260_v16 }
 0x426   :  { %v1258_v48 = vpop.permute.xlu0 %1257 }
 0x427   :  { %1302 = vst.msk [vmem:[#allocation5 + $0x40] sm:$0xff] %vm1297_vm1, %v1258_v48  ;;  %v1960_v48 = vld [vmem:[#allocation2 + $0xe8] sm:$0xff] }
 0x428   :  { %v1264_v55 = vpop.permute.xlu1 %1263 }
 0x429   :  { %1305 = vst.msk [vmem:[#allocation5 + $0x70] sm:$0xff] %vm1297_vm1, %v1264_v55 }
 0x42a   :  { %v1262_v62 = vpop.permute.xlu0 %1261 }
 0x42b   :  { %1304 = vst.msk [vmem:[#allocation5 + $0x60] sm:$0xff] %vm1297_vm1, %v1262_v62 }
 0x42c   :  { %v1268_v12 = vpop.permute.xlu1 %1267 }
 0x42d   :  { %1307 = vst.msk [vmem:[#allocation5 + $0x90] sm:$0xff] %vm1297_vm1, %v1268_v12 }
 0x42e   :  { %v1266_v17 = vpop.permute.xlu0 %1265 }
 0x42f   :  { %1306 = vst.msk [vmem:[#allocation5 + $0x80] sm:$0xff] %vm1297_vm1, %v1266_v17 }
 0x430   :  { %v1272_v18 = vpop.permute.xlu1 %1271 }
 0x431   :  { %1309 = vst.msk [vmem:[#allocation5 + $0xb0] sm:$0xff] %vm1297_vm1, %v1272_v18 }
 0x432   :  { %v1270_v2 = vpop.permute.xlu0 %1269 }
 0x433   :  { %1308 = vst.msk [vmem:[#allocation5 + $0xa0] sm:$0xff] %vm1297_vm1, %v1270_v2 }
 0x434   :  { %v1276_v0 = vpop.permute.xlu1 %1275 }
 0x435   :  { %1311 = vst.msk [vmem:[#allocation5 + $0xd0] sm:$0xff] %vm1297_vm1, %v1276_v0 }
 0x436   :  { %v1274_v45 = vpop.permute.xlu0 %1273 }
 0x437   :  { %1310 = vst.msk [vmem:[#allocation5 + $0xc0] sm:$0xff] %vm1297_vm1, %v1274_v45 }
 0x438   :  { %v1280_v22 = vpop.permute.xlu1 %1279 }
 0x439   :  { %1313 = vst.msk [vmem:[#allocation5 + $0xf0] sm:$0xff] %vm1297_vm1, %v1280_v22 }
 0x43a   :  { %v1278_v25 = vpop.permute.xlu0 %1277 }
 0x43b   :  { %1312 = vst.msk [vmem:[#allocation5 + $0xe0] sm:$0xff] %vm1297_vm1, %v1278_v25 }
 0x4a6   :  { %v4778_v44 = vpop.f32.mrf.mxu1 }
 0x4a8   :  { %v1389_v19 = vpop.f32.mrf.mxu1 }
 0x4a9   :  { %4808 = vmatprep.mubr.msk.f32.mxu0 %vm218_vm0, %v1389_v19 }
 0x4aa   :  { %v4781_v16 = vpop.f32.mrf.mxu1  ;;  %4809 = vmatmul.mubr.msk.f32.vlgmr.msra.gmra.mxu0 %vm218_vm0, %v4778_v44 }
 0x4ab   :  { %4865 = vmatpush3.msra.mxu0 %v1962_v40 }
 0x4ac   :  { %v1399_v55 = vpop.f32.mrf.mxu1  ;;  %4866 = vmatprep.subr.mxu0 %v1961_v24 }
 0x4ad   :  { %4811 = vmatprep.mubr.msk.f32.mxu0 %vm218_vm0, %v1399_v55  ;;  %4867 = vmatpush3.msra.mxu0 %v1961_v24  ;;  %v1959_v24 = vld [vmem:[#allocation2 + $0xe0] sm:$0xff] }
 0x4ae   :  { %v4784_v62 = vpop.f32.mrf.mxu1  ;;  %4812 = vmatmul.mubr.msk.f32.gmra.mxu0 %vm218_vm0, %v4781_v16  ;;  %4868 = vmatprep.subr.mxu0 %v1960_v48  ;;  %v1958_v16 = vld [vmem:[#allocation2 + $0xd8] sm:$0xff] }
 0x4af   :  { %4869 = vmatpush3.msra.mxu0 %v1960_v48 }
 0x4b0   :  { %v1409_v12 = vpop.f32.mrf.mxu1  ;;  %4870 = vmatprep.subr.mxu0 %v1959_v24 }
 0x4b1   :  { %4814 = vmatprep.mubr.msk.f32.mxu0 %vm218_vm0, %v1409_v12  ;;  %4871 = vmatpush3.msra.mxu0 %v1959_v24 }
 0x4b2   :  { %v4787_v17 = vpop.f32.mrf.mxu1  ;;  %4815 = vmatmul.mubr.msk.f32.gmra.mxu0 %vm218_vm0, %v4784_v62  ;;  %4952 = vmatprep.subr.mxu0 %v1958_v16 }
 0x4b4   :  { %v1419_v18 = vpop.f32.mrf.mxu1 }
 0x4b5   :  { %4817 = vmatprep.mubr.msk.f32.mxu0 %vm218_vm0, %v1419_v18 }
 0x4b6   :  { %v4790_v2 = vpop.f32.mrf.mxu1  ;;  %4818 = vmatmul.mubr.msk.f32.gmra.mxu0 %vm218_vm0, %v4787_v17 }
 0x4b8   :  { %v1429_v0 = vpop.f32.mrf.mxu1 }
 0x4b9   :  { %4820 = vmatprep.mubr.msk.f32.mxu0 %vm218_vm0, %v1429_v0 }
 0x4ba   :  { %v4793_v45 = vpop.f32.mrf.mxu1  ;;  %4821 = vmatmul.mubr.msk.f32.gmra.mxu0 %vm218_vm0, %v4790_v2 }
 0x4bc   :  { %v1439_v22 = vpop.f32.mrf.mxu1 }
 0x4bd   :  { %4823 = vmatprep.mubr.msk.f32.mxu0 %vm218_vm0, %v1439_v22 }
 0x4be   :  { %v4796_v25 = vpop.f32.mrf.mxu1  ;;  %4824 = vmatmul.mubr.msk.f32.gmra.mxu0 %vm218_vm0, %v4793_v45  ;;  %v6265_v45 = vld [vmem:[%s6823_s3 + $0x2] ss:$0 sm:$0xff] }
 0x4c0   :  { %v1449_v40 = vpop.f32.mrf.mxu1 }
 0x4c1   :  { %4826 = vmatprep.mubr.msk.f32.mxu0 %vm218_vm0, %v1449_v40 }
 0x4c2   :  { %v4799_v44 = vpop.f32.mrf.mxu1  ;;  %4827 = vmatmul.mubr.msk.f32.gmra.mxu0 %vm218_vm0, %v4796_v25 }
 0x4c4   :  { %v1459_v19 = vpop.f32.mrf.mxu1 }
 0x4c5   :  { %4829 = vmatprep.mubr.msk.f32.mxu0 %vm218_vm0, %v1459_v19 }
 0x4c6   :  { %4830 = vmatmul.mubr.msk.f32.gmra.mxu0 %vm218_vm0, %v4799_v44  ;;  %v4842_v48 = vpop.f32.mrf.mxu1 }
 0x4c8   :  { %v1759_v55 = vpop.f32.mrf.mxu1 }
 0x4ca   :  { %v4845_v62 = vpop.f32.mrf.mxu1 }
 0x4cc   :  { %v1769_v12 = vpop.f32.mrf.mxu1 }
 0x4ce   :  { %v4848_v17 = vpop.f32.mrf.mxu1 }
 0x4d0   :  { %v1779_v18 = vpop.f32.mrf.mxu1 }
 0x4d2   :  { %v4851_v2 = vpop.f32.mrf.mxu1 }
 0x4d4   :  { %v1789_v0 = vpop.f32.mrf.mxu1 }
 0x4d6   :  { %v4854_v40 = vpop.f32.mrf.mxu1 }
 0x4d8   :  { %v1799_v5 = vpop.f32.mrf.mxu1 }
 0x56a   :  { %v4810_v22 = vpop.f32.mrf.mxu0 }
 0x56b   :  { %v1765_v25 = vadd.f32 %v4842_v48, %v4810_v22 }
 0x56c   :  { %v1582_v44 = vpop.f32.mrf.mxu0 }
 0x56d   :  { %v1843_v19 = vadd.f32 %v6265_v45, %v1765_v25  ;;  %v1760_v24 = vadd.f32 %v1759_v55, %v1582_v44 }
 0x56e   :  { %v4813_v36 = vpop.f32.mrf.mxu0 }
 0x56f   :  { %v6268_v6 = vmax.f32 %v1843_v19, 0.0  ;;  %v1842_v14 = vadd.f32 %v6265_v45, %v1760_v24  ;;  %v1775_v10 = vadd.f32 %v4845_v62, %v4813_v36  ;;  %v4857_v36 = vpop.f32.mrf.mxu1  ;;  %v1956_v19 = vld [vmem:[#allocation2 + $0xc8] sm:$0xff] }
 0x570   :  { %v1592_v13 = vpop.f32.mrf.mxu0 }
 0x571   :  { %v6271_v3 = vmax.f32 %v1842_v14, 0.0  ;;  %v1845_v11 = vadd.f32 %v6265_v45, %v1775_v10  ;;  %v1770_v4 = vadd.f32 %v1769_v12, %v1592_v13  ;;  %1892 = vrot.lane.b32.xlu1 %v6268_v6, %s5341_s17  ;;  %v1957_v14 = vld [vmem:[#allocation2 + $0xd0] sm:$0xff]  ;;  %v1809_v24 = vpop.f32.mrf.mxu1 }
 0x572   :  { %v4816_v48 = vpop.f32.mrf.mxu0 }
 0x573   :  { %v6276_v22 = vmax.f32 %v1845_v11, 0.0  ;;  %v1844_v55 = vadd.f32 %v6265_v45, %v1770_v4  ;;  %v1785_v25 = vadd.f32 %v4848_v17, %v4816_v48  ;;  %1890 = vrot.lane.b32.xlu0 %v6271_v3, %s5341_s17  ;;  %4872 = vmatprep.mubr.msk.f32.mxu0 %vm218_vm0, %v6271_v3 }
 0x574   :  { %v1602_v10 = vpop.f32.mrf.mxu0  ;;  %4873 = vmatmul.mubr.msk.f32.vlgmr.msra.gmra.mxu0 %vm218_vm0, %v6268_v6 }
 0x575   :  { %v6285_v13 = vmax.f32 %v1844_v55, 0.0  ;;  %v1847_v11 = vadd.f32 %v6265_v45, %v1785_v25  ;;  %v1780_v62 = vadd.f32 %v1779_v18, %v1602_v10  ;;  %1896 = vrot.lane.b32.xlu1 %v6276_v22, %s5341_s17  ;;  %4953 = vmatpush3.msra.mxu0 %v1958_v16 }
 0x576   :  { %v4819_v4 = vpop.f32.mrf.mxu0  ;;  %4954 = vmatprep.subr.mxu0 %v1957_v14 }
 0x577   :  { %v6290_v12 = vmax.f32 %v1847_v11, 0.0  ;;  %v1846_v17 = vadd.f32 %v6265_v45, %v1780_v62  ;;  %v1795_v44 = vadd.f32 %v4851_v2, %v4819_v4  ;;  %1894 = vrot.lane.b32.xlu0 %v6285_v13, %s5341_s17  ;;  %4875 = vmatprep.mubr.msk.f32.mxu0 %vm218_vm0, %v6285_v13  ;;  %v1955_v62 = vld [vmem:[#allocation2 + $0xc0] sm:$0xff]  ;;  %v4860_v4 = vpop.f32.mrf.mxu1 }
 0x578   :  { %v1612_v18 = vpop.f32.mrf.mxu0  ;;  %4876 = vmatmul.mubr.msk.f32.gmra.mxu0 %vm218_vm0, %v6276_v22 }
 0x579   :  { %v6299_v16 = vmax.f32 %v1846_v17, 0.0  ;;  %v1849_v48 = vadd.f32 %v6265_v45, %v1795_v44  ;;  %v1790_v55 = vadd.f32 %v1789_v0, %v1612_v18  ;;  %1900 = vrot.lane.b32.xlu1 %v6290_v12, %s5341_s17  ;;  %4955 = vmatpush3.msra.mxu0 %v1957_v14 }
 0x57a   :  { %v4822_v2 = vpop.f32.mrf.mxu0  ;;  %4956 = vmatprep.subr.mxu0 %v1956_v19 }
 0x57b   :  { %v6304_v25 = vmax.f32 %v1849_v48, 0.0  ;;  %v1848_v10 = vadd.f32 %v6265_v45, %v1790_v55  ;;  %v1805_v11 = vadd.f32 %v4854_v40, %v4822_v2  ;;  %1898 = vrot.lane.b32.xlu0 %v6299_v16, %s5341_s17  ;;  %4878 = vmatprep.mubr.msk.f32.mxu0 %vm218_vm0, %v6299_v16  ;;  %v1819_v2 = vpop.f32.mrf.mxu1 }
 0x57c   :  { %v1622_v0 = vpop.f32.mrf.mxu0  ;;  %4879 = vmatmul.mubr.msk.f32.gmra.mxu0 %vm218_vm0, %v6290_v12 }
 0x57d   :  { %v1864_v14 = vmax.f32 %v1848_v10, 0.0  ;;  %v1851_v17 = vadd.f32 %v6265_v45, %v1805_v11  ;;  %v1800_v44 = vadd.f32 %v1799_v5, %v1622_v0  ;;  %1904 = vrot.lane.b32.xlu1 %v6304_v25, %s5341_s17  ;;  %4957 = vmatpush3.msra.mxu0 %v1956_v19 }
 0x57e   :  { %v4825_v40 = vpop.f32.mrf.mxu0  ;;  %4958 = vmatprep.subr.mxu0 %v1955_v62 }
 0x57f   :  { %v1867_v18 = vmax.f32 %v1851_v17, 0.0  ;;  %v1850_v48 = vadd.f32 %v6265_v45, %v1800_v44  ;;  %v1815_v55 = vadd.f32 %v4857_v36, %v4825_v40  ;;  %1902 = vrot.lane.b32.xlu0 %v1864_v14, %s5341_s17  ;;  %4881 = vmatprep.mubr.msk.f32.mxu0 %vm218_vm0, %v1864_v14  ;;  %v4863_v44 = vpop.f32.mrf.mxu1 }
 0x580   :  { %v1632_v60 = vpop.f32.mrf.mxu0  ;;  %4882 = vmatmul.mubr.msk.f32.gmra.mxu0 %vm218_vm0, %v6304_v25 }
 0x581   :  { %v1866_v5 = vmax.f32 %v1850_v48, 0.0  ;;  %v1853_v10 = vadd.f32 %v6265_v45, %v1815_v55  ;;  %v1810_v11 = vadd.f32 %v1809_v24, %v1632_v60  ;;  %1908 = vrot.lane.b32.xlu1 %v1867_v18, %s5341_s17  ;;  %4959 = vmatpush3.msra.mxu0 %v1955_v62 }
 0x582   :  { %v4828_v19 = vpop.f32.mrf.mxu0 }
 0x583   :  { %v1869_v0 = vmax.f32 %v1853_v10, 0.0  ;;  %v1852_v36 = vadd.f32 %v6265_v45, %v1810_v11  ;;  %v1825_v17 = vadd.f32 %v4860_v4, %v4828_v19  ;;  %1906 = vrot.lane.b32.xlu0 %v1866_v5, %s5341_s17  ;;  %4884 = vmatprep.mubr.msk.f32.mxu0 %vm218_vm0, %v1866_v5  ;;  %v1829_v4 = vpop.f32.mrf.mxu1 }
 0x584   :  { %v1642_v40 = vpop.f32.mrf.mxu0  ;;  %4885 = vmatmul.mubr.msk.f32.gmra.mxu0 %vm218_vm0, %v1867_v18 }
 0x585   :  { %v1868_v48 = vmax.f32 %v1852_v36, 0.0  ;;  %v1855_v55 = vadd.f32 %v6265_v45, %v1825_v17  ;;  %v1820_v60 = vadd.f32 %v1819_v2, %v1642_v40  ;;  %1912 = vrot.lane.b32.xlu1 %v1869_v0, %s5341_s17 }
 0x586   :  { %v4831_v24 = vpop.f32.mrf.mxu0 }
 0x587   :  { %v1871_v62 = vmax.f32 %v1855_v55, 0.0  ;;  %v1854_v10 = vadd.f32 %v6265_v45, %v1820_v60  ;;  %v1835_v11 = vadd.f32 %v4863_v44, %v4831_v24  ;;  %1910 = vrot.lane.b32.xlu0 %v1868_v48, %s5341_s17  ;;  %4887 = vmatprep.mubr.msk.f32.mxu0 %vm218_vm0, %v1868_v48 }
 0x588   :  { %v1652_v19 = vpop.f32.mrf.mxu0  ;;  %4888 = vmatmul.mubr.msk.f32.gmra.mxu0 %vm218_vm0, %v1869_v0 }
 0x589   :  { %v1870_v56 = vmax.f32 %v1854_v10, 0.0  ;;  %v1857_v36 = vadd.f32 %v6265_v45, %v1835_v11  ;;  %v1830_v17 = vadd.f32 %v1829_v4, %v1652_v19  ;;  %1916 = vrot.lane.b32.xlu1 %v1871_v62, %s5341_s17 }
 0x58b   :  { %v1873_v2 = vmax.f32 %v1857_v36, 0.0  ;;  %v1856_v40 = vadd.f32 %v6265_v45, %v1830_v17  ;;  %1914 = vrot.lane.b32.xlu0 %v1870_v56, %s5341_s17  ;;  %4890 = vmatprep.mubr.msk.f32.mxu0 %vm218_vm0, %v1870_v56 }
 0x58c   :  { %4891 = vmatmul.mubr.msk.f32.gmra.mxu0 %vm218_vm0, %v1871_v62 }
 0x58d   :  { %v1872_v44 = vmax.f32 %v1856_v40, 0.0  ;;  %1920 = vrot.lane.b32.xlu1 %v1873_v2, %s5341_s17 }
 0x58f   :  { %1918 = vrot.lane.b32.xlu0 %v1872_v44, %s5341_s17  ;;  %4893 = vmatprep.mubr.msk.f32.mxu0 %vm218_vm0, %v1872_v44 }
 0x590   :  { %4894 = vmatmul.mubr.msk.f32.gmra.mxu0 %vm218_vm0, %v1873_v2 }
 0x591   :  { %4960 = vmatprep.mubr.msk.f32.mxu0 %vm218_vm0, %v6271_v3 }
 0x594   :  { %4961 = vmatmul.mubr.msk.f32.vlgmr.msra.gmra.mxu0 %vm218_vm0, %v6268_v6 }
 0x595   :  { %4963 = vmatprep.mubr.msk.f32.mxu0 %vm218_vm0, %v6285_v13 }
 0x598   :  { %4964 = vmatmul.mubr.msk.f32.gmra.mxu0 %vm218_vm0, %v6276_v22 }
 0x599   :  { %4966 = vmatprep.mubr.msk.f32.mxu0 %vm218_vm0, %v6299_v16 }
 0x59c   :  { %4967 = vmatmul.mubr.msk.f32.gmra.mxu0 %vm218_vm0, %v6290_v12 }
 0x59d   :  { %4969 = vmatprep.mubr.msk.f32.mxu0 %vm218_vm0, %v1864_v14 }
 0x5a0   :  { %4970 = vmatmul.mubr.msk.f32.gmra.mxu0 %vm218_vm0, %v6304_v25 }
 0x5a1   :  { %4972 = vmatprep.mubr.msk.f32.mxu0 %vm218_vm0, %v1866_v5 }
 0x5a4   :  { %4973 = vmatmul.mubr.msk.f32.gmra.mxu0 %vm218_vm0, %v1867_v18 }
 0x5a5   :  { %4975 = vmatprep.mubr.msk.f32.mxu0 %vm218_vm0, %v1868_v48 }
 0x5a8   :  { %4976 = vmatmul.mubr.msk.f32.gmra.mxu0 %vm218_vm0, %v1869_v0 }
 0x5a9   :  { %4978 = vmatprep.mubr.msk.f32.mxu0 %vm218_vm0, %v1870_v56 }
 0x5ac   :  { %4979 = vmatmul.mubr.msk.f32.gmra.mxu0 %vm218_vm0, %v1871_v62 }
 0x5ad   :  { %4981 = vmatprep.mubr.msk.f32.mxu0 %vm218_vm0, %v1872_v44 }
 0x5b0   :  { %4982 = vmatmul.mubr.msk.f32.gmra.mxu0 %vm218_vm0, %v1873_v2 }
 0x5e3   :  { %v1893_v3 = vpop.permute.xlu1 %1892 }
 0x5e4   :  { %1940 = vst.msk [vmem:[#allocation5 + $0x10] sm:$0xff] %vm1938_vm2, %v1893_v3 }
 0x5e5   :  { %v1891_v6 = vpop.permute.xlu0 %1890 }
 0x5e6   :  { %1939 = vst.msk [vmem:[#allocation5] sm:$0xff] %vm1938_vm2, %v1891_v6 }
 0x5e7   :  { %v1897_v45 = vpop.permute.xlu1 %1896 }
 0x5e8   :  { %1942 = vst.msk [vmem:[#allocation5 + $0x30] sm:$0xff] %vm1938_vm2, %v1897_v45 }
 0x5e9   :  { %v1895_v22 = vpop.permute.xlu0 %1894 }
 0x5ea   :  { %1941 = vst.msk [vmem:[#allocation5 + $0x20] sm:$0xff] %vm1938_vm2, %v1895_v22 }
 0x5eb   :  { %v1901_v56 = vpop.permute.xlu1 %1900 }
 0x5ec   :  { %1944 = vst.msk [vmem:[#allocation5 + $0x50] sm:$0xff] %vm1938_vm2, %v1901_v56 }
 0x5ed   :  { %v1899_v13 = vpop.permute.xlu0 %1898 }
 0x5ee   :  { %1943 = vst.msk [vmem:[#allocation5 + $0x40] sm:$0xff] %vm1938_vm2, %v1899_v13  ;;  %v2598_v13 = vld [vmem:[#allocation2 + $0x108] sm:$0xff] }
 0x5ef   :  { %v1905_v12 = vpop.permute.xlu1 %1904 }
 0x5f0   :  { %1946 = vst.msk [vmem:[#allocation5 + $0x70] sm:$0xff] %vm1938_vm2, %v1905_v12  ;;  %v2597_v12 = vld [vmem:[#allocation2 + $0x100] sm:$0xff] }
 0x5f1   :  { %v1903_v16 = vpop.permute.xlu0 %1902 }
 0x5f2   :  { %1945 = vst.msk [vmem:[#allocation5 + $0x60] sm:$0xff] %vm1938_vm2, %v1903_v16 }
 0x5f3   :  { %v1909_v25 = vpop.permute.xlu1 %1908 }
 0x5f4   :  { %1948 = vst.msk [vmem:[#allocation5 + $0x90] sm:$0xff] %vm1938_vm2, %v1909_v25 }
 0x5f5   :  { %v1907_v14 = vpop.permute.xlu0 %1906 }
 0x5f6   :  { %1947 = vst.msk [vmem:[#allocation5 + $0x80] sm:$0xff] %vm1938_vm2, %v1907_v14 }
 0x5f7   :  { %v1913_v18 = vpop.permute.xlu1 %1912 }
 0x5f8   :  { %1950 = vst.msk [vmem:[#allocation5 + $0xb0] sm:$0xff] %vm1938_vm2, %v1913_v18 }
 0x5f9   :  { %v1911_v5 = vpop.permute.xlu0 %1910 }
 0x5fa   :  { %1949 = vst.msk [vmem:[#allocation5 + $0xa0] sm:$0xff] %vm1938_vm2, %v1911_v5 }
 0x5fb   :  { %v1917_v0 = vpop.permute.xlu1 %1916 }
 0x5fc   :  { %1952 = vst.msk [vmem:[#allocation5 + $0xd0] sm:$0xff] %vm1938_vm2, %v1917_v0 }
 0x5fd   :  { %v1915_v48 = vpop.permute.xlu0 %1914 }
 0x5fe   :  { %1951 = vst.msk [vmem:[#allocation5 + $0xc0] sm:$0xff] %vm1938_vm2, %v1915_v48 }
 0x5ff   :  { %v1921_v55 = vpop.permute.xlu1 %1920 }
 0x600   :  { %1954 = vst.msk [vmem:[#allocation5 + $0xf0] sm:$0xff] %vm1938_vm2, %v1921_v55 }
 0x601   :  { %v1919_v60 = vpop.permute.xlu0 %1918 }
 0x602   :  { %1953 = vst.msk [vmem:[#allocation5 + $0xe0] sm:$0xff] %vm1938_vm2, %v1919_v60 }
 0x634   :  { %v4874_v24 = vpop.f32.mrf.mxu0 }
 0x636   :  { %v2062_v62 = vpop.f32.mrf.mxu0 }
 0x638   :  { %v4877_v10 = vpop.f32.mrf.mxu0 }
 0x63a   :  { %v2072_v11 = vpop.f32.mrf.mxu0 }
 0x63c   :  { %v4880_v4 = vpop.f32.mrf.mxu0 }
 0x63e   :  { %v2082_v19 = vpop.f32.mrf.mxu0 }
 0x640   :  { %v4883_v36 = vpop.f32.mrf.mxu0 }
 0x642   :  { %v2092_v17 = vpop.f32.mrf.mxu0 }
 0x644   :  { %v4886_v2 = vpop.f32.mrf.mxu0 }
 0x646   :  { %v2102_v40 = vpop.f32.mrf.mxu0 }
 0x648   :  { %v4889_v44 = vpop.f32.mrf.mxu0 }
 0x64a   :  { %v2112_v3 = vpop.f32.mrf.mxu0 }
 0x64c   :  { %v4892_v6 = vpop.f32.mrf.mxu0 }
 0x64e   :  { %v2122_v45 = vpop.f32.mrf.mxu0 }
 0x650   :  { %v4895_v22 = vpop.f32.mrf.mxu0 }
 0x651   :  { %4896 = vmatprep.subr.mxu1 %v4895_v22 }
 0x652   :  { %v2132_v56 = vpop.f32.mrf.mxu0  ;;  %4897 = vmatpush3.msra.mxu1 %v4895_v22 }
 0x653   :  { %4898 = vmatprep.subr.mxu1 %v2132_v56 }
 0x654   :  { %4899 = vmatpush3.msra.mxu1 %v2132_v56 }
 0x655   :  { %4900 = vmatprep.subr.mxu1 %v4892_v6 }
 0x656   :  { %4901 = vmatpush3.msra.mxu1 %v4892_v6 }
 0x657   :  { %4902 = vmatprep.subr.mxu1 %v2122_v45 }
 0x658   :  { %4903 = vmatpush3.msra.mxu1 %v2122_v45 }
 0x659   :  { %4904 = vmatprep.subr.mxu1 %v4889_v44 }
 0x65a   :  { %4905 = vmatpush3.msra.mxu1 %v4889_v44 }
 0x65b   :  { %4906 = vmatprep.subr.mxu1 %v2112_v3 }
 0x65c   :  { %4907 = vmatpush3.msra.mxu1 %v2112_v3 }
 0x65d   :  { %4908 = vmatprep.subr.mxu1 %v4886_v2 }
 0x65e   :  { %4909 = vmatpush3.msra.mxu1 %v4886_v2 }
 0x65f   :  { %4910 = vmatprep.subr.mxu1 %v2102_v40 }
 0x660   :  { %4911 = vmatpush3.msra.mxu1 %v2102_v40  ;;  %v3291_v40 = vld [vmem:[#allocation2 + $0x158] sm:$0xff] }
 0x661   :  { %4912 = vmatprep.subr.mxu1 %v4883_v36 }
 0x662   :  { %4913 = vmatpush3.msra.mxu1 %v4883_v36 }
 0x663   :  { %4914 = vmatprep.subr.mxu1 %v2092_v17 }
 0x664   :  { %4915 = vmatpush3.msra.mxu1 %v2092_v17 }
 0x665   :  { %4916 = vmatprep.subr.mxu1 %v4880_v4 }
 0x666   :  { %4917 = vmatpush3.msra.mxu1 %v4880_v4 }
 0x667   :  { %4918 = vmatprep.subr.mxu1 %v2082_v19 }
 0x668   :  { %4919 = vmatpush3.msra.mxu1 %v2082_v19 }
 0x669   :  { %4920 = vmatprep.subr.mxu1 %v4877_v10 }
 0x66a   :  { %4921 = vmatpush3.msra.mxu1 %v4877_v10 }
 0x66b   :  { %4922 = vmatprep.subr.mxu1 %v2072_v11 }
 0x66c   :  { %4923 = vmatpush3.msra.mxu1 %v2072_v11 }
 0x66d   :  { %4924 = vmatprep.subr.mxu1 %v4874_v24 }
 0x66e   :  { %4925 = vmatpush3.msra.mxu1 %v4874_v24 }
 0x66f   :  { %4926 = vmatprep.subr.mxu1 %v2062_v62 }
 0x670   :  { %4927 = vmatpush3.msra.mxu1 %v2062_v62 }
 0x671   :  { %4929 = vmatmul.mubr.f32.vlgmr.msra.gmra.mxu1 %v6069_v20  ;;  %4984 = vmatprep.subr.mxu1 %v5987_v61 }
 0x672   :  { %4985 = vmatpush3.msra.mxu1 %v5987_v61  ;;  %4931 = vmatprep.mubr.f32.mxu1 %v6075_v21 }
 0x673   :  { %4986 = vmatprep.subr.mxu1 %v6006_v28 }
 0x674   :  { %4987 = vmatpush3.msra.mxu1 %v6006_v28 }
 0x675   :  { %4932 = vmatmul.mubr.f32.gmra.mxu1 %v6085_v27  ;;  %4988 = vmatprep.subr.mxu1 %v5980_v54 }
 0x676   :  { %4989 = vmatpush3.msra.mxu1 %v5980_v54  ;;  %4934 = vmatprep.mubr.f32.mxu1 %v6091_v30 }
 0x677   :  { %4990 = vmatprep.subr.mxu1 %v5999_v15 }
 0x678   :  { %4991 = vmatpush3.msra.mxu1 %v5999_v15 }
 0x679   :  { %4935 = vmatmul.mubr.f32.gmra.mxu1 %v6099_v32  ;;  %4992 = vmatprep.subr.mxu1 %v6022_v35 }
 0x67a   :  { %4993 = vmatpush3.msra.mxu1 %v6022_v35  ;;  %4937 = vmatprep.mubr.f32.mxu1 %v6105_v33 }
 0x67b   :  { %4994 = vmatprep.subr.mxu1 %v6018_v57 }
 0x67c   :  { %4995 = vmatpush3.msra.mxu1 %v6018_v57 }
 0x67d   :  { %4938 = vmatmul.mubr.f32.gmra.mxu1 %v6113_v38  ;;  %4996 = vmatprep.subr.mxu1 %v6032_v7 }
 0x67e   :  { %4997 = vmatpush3.msra.mxu1 %v6032_v7  ;;  %4940 = vmatprep.mubr.f32.mxu1 %v6119_v42 }
 0x67f   :  { %4998 = vmatprep.subr.mxu1 %v6028_v37 }
 0x680   :  { %4999 = vmatpush3.msra.mxu1 %v6028_v37 }
 0x681   :  { %4941 = vmatmul.mubr.f32.gmra.mxu1 %v6129_v49  ;;  %5000 = vmatprep.subr.mxu1 %v6042_v41 }
 0x682   :  { %5001 = vmatpush3.msra.mxu1 %v6042_v41  ;;  %4943 = vmatprep.mubr.f32.mxu1 %v6135_v50 }
 0x683   :  { %5002 = vmatprep.subr.mxu1 %v6038_v39 }
 0x684   :  { %5003 = vmatpush3.msra.mxu1 %v6038_v39 }
 0x685   :  { %4944 = vmatmul.mubr.f32.gmra.mxu1 %v6143_v52  ;;  %5004 = vmatprep.subr.mxu1 %v6052_v43 }
 0x686   :  { %5005 = vmatpush3.msra.mxu1 %v6052_v43  ;;  %4946 = vmatprep.mubr.f32.mxu1 %v6149_v53 }
 0x687   :  { %5006 = vmatprep.subr.mxu1 %v6048_v1 }
 0x688   :  { %5007 = vmatpush3.msra.mxu1 %v6048_v1 }
 0x689   :  { %4947 = vmatmul.mubr.f32.gmra.mxu1 %v6157_v58  ;;  %5008 = vmatprep.subr.mxu1 %v6062_v9 }
 0x68a   :  { %5009 = vmatpush3.msra.mxu1 %v6062_v9  ;;  %4949 = vmatprep.mubr.f32.mxu1 %v6163_v59 }
 0x68b   :  { %5010 = vmatprep.subr.mxu1 %v6058_v8 }
 0x68c   :  { %5011 = vmatpush3.msra.mxu1 %v6058_v8 }
 0x68d   :  { %4950 = vmatmul.mubr.f32.gmra.mxu1 %v6173_v63  ;;  %5012 = vmatprep.subr.mxu1 %v6080_v26 }
 0x68e   :  { %5013 = vmatpush3.msra.mxu1 %v6080_v26  ;;  %5016 = vmatprep.mubr.f32.mxu1 %v6231_v29 }
 0x68f   :  { %5014 = vmatprep.subr.mxu1 %v6078_v23 }
 0x690   :  { %5015 = vmatpush3.msra.mxu1 %v6078_v23 }
 0x691   :  { %5017 = vmatmul.mubr.f32.vlgmr.msra.gmra.mxu1 %v6069_v20  ;;  %5068 = vmatprep.subr.mxu1 %v2598_v13  ;;  %v2600_v20 = vld [vmem:[#allocation2 + $0x118] sm:$0xff] }
 0x692   :  { %5019 = vmatprep.mubr.f32.mxu1 %v6075_v21  ;;  %5069 = vmatpush3.msra.mxu1 %v2598_v13 }
 0x693   :  { %5070 = vmatprep.subr.mxu1 %v2597_v12  ;;  %5040 = vmatprep.subr.mxu0 %v2600_v20 }
 0x694   :  { %5071 = vmatpush3.msra.mxu1 %v2597_v12  ;;  %5041 = vmatpush3.msra.mxu0 %v2600_v20 }
 0x695   :  { %5020 = vmatmul.mubr.f32.gmra.mxu1 %v6085_v27 }
 0x696   :  { %5022 = vmatprep.mubr.f32.mxu1 %v6091_v30 }
 0x699   :  { %5023 = vmatmul.mubr.f32.gmra.mxu1 %v6099_v32 }
 0x69a   :  { %5025 = vmatprep.mubr.f32.mxu1 %v6105_v33 }
 0x69d   :  { %5026 = vmatmul.mubr.f32.gmra.mxu1 %v6113_v38 }
 0x69e   :  { %5028 = vmatprep.mubr.f32.mxu1 %v6119_v42 }
 0x6a1   :  { %5029 = vmatmul.mubr.f32.gmra.mxu1 %v6129_v49 }
 0x6a2   :  { %5031 = vmatprep.mubr.f32.mxu1 %v6135_v50 }
 0x6a5   :  { %5032 = vmatmul.mubr.f32.gmra.mxu1 %v6143_v52 }
 0x6a6   :  { %5034 = vmatprep.mubr.f32.mxu1 %v6149_v53 }
 0x6a9   :  { %5035 = vmatmul.mubr.f32.gmra.mxu1 %v6157_v58 }
 0x6aa   :  { %5037 = vmatprep.mubr.f32.mxu1 %v6163_v59 }
 0x6ad   :  { %5038 = vmatmul.mubr.f32.gmra.mxu1 %v6173_v63 }
 0x6ae   :  { %5072 = vmatprep.mubr.msk.f32.mxu1 %vm2795_vm3, %v6078_v23 }
 0x6b1   :  { %5073 = vmatmul.mubr.msk.f32.vlgmr.msra.gmra.mxu1 %vm2795_vm3, %v6080_v26 }
 0x6b2   :  { %5075 = vmatprep.mubr.msk.f32.mxu1 %vm2795_vm3, %v6058_v8 }
 0x6b5   :  { %5076 = vmatmul.mubr.msk.f32.gmra.mxu1 %vm2795_vm3, %v6062_v9 }
 0x6b6   :  { %5078 = vmatprep.mubr.msk.f32.mxu1 %vm2795_vm3, %v6048_v1 }
 0x6b9   :  { %5079 = vmatmul.mubr.msk.f32.gmra.mxu1 %vm2795_vm3, %v6052_v43 }
 0x6ba   :  { %5081 = vmatprep.mubr.msk.f32.mxu1 %vm2795_vm3, %v6038_v39  ;;  %v2599_v39 = vld [vmem:[#allocation2 + $0x110] sm:$0xff] }
 0x6bb   :  { %5042 = vmatprep.subr.mxu0 %v2599_v39 }
 0x6bc   :  { %5043 = vmatpush3.msra.mxu0 %v2599_v39 }
 0x6bd   :  { %5082 = vmatmul.mubr.msk.f32.gmra.mxu1 %vm2795_vm3, %v6042_v41  ;;  %5096 = vmatprep.subr.mxu0 %v3291_v40 }
 0x6be   :  { %5084 = vmatprep.mubr.msk.f32.mxu1 %vm2795_vm3, %v6028_v37 }
 0x6c1   :  { %5085 = vmatmul.mubr.msk.f32.gmra.mxu1 %vm2795_vm3, %v6032_v7 }
 0x6c2   :  { %5087 = vmatprep.mubr.msk.f32.mxu1 %vm2795_vm3, %v6018_v57  ;;  %v4962_v57 = vpop.f32.mrf.mxu0 }
 0x6c4   :  { %v2352_v37 = vpop.f32.mrf.mxu0 }
 0x6c5   :  { %5088 = vmatmul.mubr.msk.f32.gmra.mxu1 %vm2795_vm3, %v6022_v35 }
 0x6c6   :  { %5090 = vmatprep.mubr.msk.f32.mxu1 %vm2795_vm3, %v5999_v15  ;;  %v4965_v35 = vpop.f32.mrf.mxu0 }
 0x6c8   :  { %v2362_v7 = vpop.f32.mrf.mxu0 }
 0x6c9   :  { %5091 = vmatmul.mubr.msk.f32.gmra.mxu1 %vm2795_vm3, %v5980_v54  ;;  %v6481_v54 = vld [vmem:[%s6823_s3 + $0x3] ss:$0 sm:$0xff] }
 0x6ca   :  { %5093 = vmatprep.mubr.msk.f32.mxu1 %vm2795_vm3, %v6006_v28  ;;  %v4968_v41 = vpop.f32.mrf.mxu0 }
 0x6cc   :  { %v2372_v15 = vpop.f32.mrf.mxu0 }
 0x6cd   :  { %5094 = vmatmul.mubr.msk.f32.gmra.mxu1 %vm2795_vm3, %v5987_v61 }
 0x6ce   :  { %5160 = vmatprep.mubr.f32.mxu1 %v6231_v29  ;;  %v4971_v1 = vpop.f32.mrf.mxu0 }
 0x6d0   :  { %v2382_v43 = vpop.f32.mrf.mxu0 }
 0x6d2   :  { %v4974_v9 = vpop.f32.mrf.mxu0 }
 0x6d4   :  { %v2392_v32 = vpop.f32.mrf.mxu0 }
 0x6d6   :  { %v4977_v53 = vpop.f32.mrf.mxu0 }
 0x6d8   :  { %v2402_v14 = vpop.f32.mrf.mxu0 }
 0x6da   :  { %v4980_v24 = vpop.f32.mrf.mxu0 }
 0x6dc   :  { %v2412_v17 = vpop.f32.mrf.mxu0 }
 0x6de   :  { %v4983_v56 = vpop.f32.mrf.mxu0 }
 0x731   :  { %v4930_v28 = vpop.f32.mrf.mxu1 }
 0x732   :  { %v2358_v8 = vadd.f32 %v4962_v57, %v4930_v28 }
 0x733   :  { %v2207_v21 = vpop.f32.mrf.mxu1 }
 0x734   :  { %v2436_v61 = vadd.f32 %v6481_v54, %v2358_v8  ;;  %v2353_v23 = vadd.f32 %v2352_v37, %v2207_v21  ;;  %v3290_v8 = vld [vmem:[#allocation2 + $0x150] sm:$0xff]  ;;  %v3289_v21 = vld [vmem:[#allocation2 + $0x148] sm:$0xff] }
 0x735   :  { %v4933_v26 = vpop.f32.mrf.mxu1 }
 0x736   :  { %v2435_v27 = vadd.f32 %v6481_v54, %v2353_v23  ;;  %v2368_v30 = vadd.f32 %v4965_v35, %v4933_v26  ;;  %2469 = vrot.lane.b32.xlu1 %v2436_v61, %s5338_s1  ;;  %v2422_v35 = vpop.f32.mrf.mxu0 }
 0x737   :  { %v2217_v33 = vpop.f32.mrf.mxu1 }
 0x738   :  { %v2438_v38 = vadd.f32 %v6481_v54, %v2368_v30  ;;  %v2363_v42 = vadd.f32 %v2362_v7, %v2217_v33  ;;  %2467 = vrot.lane.b32.xlu0 %v2435_v27, %s5338_s1 }
 0x739   :  { %v4936_v49 = vpop.f32.mrf.mxu1 }
 0x73a   :  { %v2437_v50 = vadd.f32 %v6481_v54, %v2363_v42  ;;  %v2378_v52 = vadd.f32 %v4968_v41, %v4936_v49  ;;  %2473 = vrot.lane.b32.xlu1 %v2438_v38, %s5338_s1 }
 0x73b   :  { %v2227_v58 = vpop.f32.mrf.mxu1 }
 0x73c   :  { %v2440_v59 = vadd.f32 %v6481_v54, %v2378_v52  ;;  %v2373_v63 = vadd.f32 %v2372_v15, %v2227_v58  ;;  %2471 = vrot.lane.b32.xlu0 %v2437_v50, %s5338_s1 }
 0x73d   :  { %v4939_v29 = vpop.f32.mrf.mxu1 }
 0x73e   :  { %v2439_v16 = vadd.f32 %v6481_v54, %v2373_v63  ;;  %v2388_v25 = vadd.f32 %v4971_v1, %v4939_v29  ;;  %2477 = vrot.lane.b32.xlu1 %v2440_v59, %s5338_s1 }
 0x73f   :  { %v2237_v18 = vpop.f32.mrf.mxu1 }
 0x740   :  { %v2442_v5 = vadd.f32 %v6481_v54, %v2388_v25  ;;  %v2383_v0 = vadd.f32 %v2382_v43, %v2237_v18  ;;  %2475 = vrot.lane.b32.xlu0 %v2439_v16, %s5338_s1  ;;  %v6547_v25 = vld [vmem:[#allocation2 + $0x138] sm:$0xff] }
 0x741   :  { %v4942_v48 = vpop.f32.mrf.mxu1 }
 0x742   :  { %v2441_v55 = vadd.f32 %v6481_v54, %v2383_v0  ;;  %v2398_v60 = vadd.f32 %v4974_v9, %v4942_v48  ;;  %2481 = vrot.lane.b32.xlu1 %v2442_v5, %s5338_s1  ;;  %v6839_v0 = vld [vmem:[#allocation11_spill] sm:$0xff] }
 0x743   :  { %v2247_v62 = vpop.f32.mrf.mxu1 }
 0x744   :  { %v2444_v10 = vadd.f32 %v6481_v54, %v2398_v60  ;;  %v2393_v11 = vadd.f32 %v2392_v32, %v2247_v62  ;;  %2479 = vrot.lane.b32.xlu0 %v2441_v55, %s5338_s1  ;;  %v6840_v55 = vld [vmem:[#allocation12_spill] sm:$0xff] }
 0x745   :  { %v4945_v4 = vpop.f32.mrf.mxu1 }
 0x746   :  { %v2443_v19 = vadd.f32 %v6481_v54, %v2393_v11  ;;  %v2408_v36 = vadd.f32 %v4977_v53, %v4945_v4  ;;  %2485 = vrot.lane.b32.xlu1 %v2444_v10, %s5338_s1  ;;  %v3288_v53 = vld [vmem:[#allocation2 + $0x140] sm:$0xff]  ;;  %v6842_v10 = vld [vmem:[#allocation14_spill] sm:$0xff]  ;;  %v6843_v4 = vld [vmem:[#allocation15_spill] sm:$0xff] }
 0x747   :  { %v2257_v2 = vpop.f32.mrf.mxu1 }
 0x748   :  { %v2446_v44 = vadd.f32 %v6481_v54, %v2408_v36  ;;  %v2403_v3 = vadd.f32 %v2402_v14, %v2257_v2  ;;  %2483 = vrot.lane.b32.xlu0 %v2443_v19, %s5338_s1  ;;  %v6836_v14 = vld [vmem:[#allocation8_spill] sm:$0xff]  ;;  %v6845_v2 = vld [vmem:[#allocation17_spill] sm:$0xff] }
 0x749   :  { %v4948_v6 = vpop.f32.mrf.mxu1  ;;  %v6844_v36 = vld [vmem:[#allocation16_spill] sm:$0xff] }
 0x74a   :  { %v2445_v45 = vadd.f32 %v6481_v54, %v2403_v3  ;;  %v2418_v22 = vadd.f32 %v4980_v24, %v4948_v6  ;;  %2489 = vrot.lane.b32.xlu1 %v2446_v44, %s5338_s1  ;;  %v6841_v24 = vld [vmem:[#allocation13_spill] sm:$0xff] }
 0x74b   :  { %v2267_v13 = vpop.f32.mrf.mxu1 }
 0x74c   :  { %v2448_v12 = vadd.f32 %v6481_v54, %v2418_v22  ;;  %v2413_v20 = vadd.f32 %v2412_v17, %v2267_v13  ;;  %2487 = vrot.lane.b32.xlu0 %v2445_v45, %s5338_s1 }
 0x74d   :  { %v4951_v39 = vpop.f32.mrf.mxu1 }
 0x74e   :  { %v2447_v57 = vadd.f32 %v6481_v54, %v2413_v20  ;;  %v2428_v37 = vadd.f32 %v4983_v56, %v4951_v39  ;;  %2493 = vrot.lane.b32.xlu1 %v2448_v12, %s5338_s1  ;;  %v6585_v20 = vld [vmem:[%s6823_s3 + $0x4] ss:$0 sm:$0xff] }
 0x74f   :  { %v2277_v7 = vpop.f32.mrf.mxu1 }
 0x750   :  { %v2450_v41 = vadd.f32 %v6481_v54, %v2428_v37  ;;  %v2423_v15 = vadd.f32 %v2422_v35, %v2277_v7  ;;  %2491 = vrot.lane.b32.xlu0 %v2447_v57, %s5338_s1 }
 0x751   :  { %v5018_v1 = vpop.f32.mrf.mxu1 }
 0x752   :  { %v2449_v43 = vadd.f32 %v6481_v54, %v2423_v15  ;;  %2497 = vrot.lane.b32.xlu1 %v2450_v41, %s5338_s1 }
 0x753   :  { %v2716_v28 = vpop.f32.mrf.mxu1 }
 0x754   :  { %5044 = vmatprep.mubr.msk.f32.mxu0 %vm2795_vm3, %v2716_v28  ;;  %2495 = vrot.lane.b32.xlu0 %v2449_v43, %s5338_s1 }
 0x755   :  { %v5021_v9 = vpop.f32.mrf.mxu1  ;;  %5045 = vmatmul.mubr.msk.f32.vlgmr.msra.gmra.mxu0 %vm2795_vm3, %v5018_v1 }
 0x756   :  { %5097 = vmatpush3.msra.mxu0 %v3291_v40  ;;  %v6846_v40 = vld [vmem:[#allocation18_spill] sm:$0xff] }
 0x757   :  { %v2726_v61 = vpop.f32.mrf.mxu1  ;;  %5098 = vmatprep.subr.mxu0 %v3290_v8 }
 0x758   :  { %5047 = vmatprep.mubr.msk.f32.mxu0 %vm2795_vm3, %v2726_v61  ;;  %5099 = vmatpush3.msra.mxu0 %v3290_v8  ;;  %v3286_v61 = vld [vmem:[#allocation2 + $0x130] sm:$0xff] }
 0x759   :  { %v5024_v23 = vpop.f32.mrf.mxu1  ;;  %5048 = vmatmul.mubr.msk.f32.gmra.mxu0 %vm2795_vm3, %v5021_v9  ;;  %5100 = vmatprep.subr.mxu0 %v3289_v21 }
 0x75a   :  { %5101 = vmatpush3.msra.mxu0 %v3289_v21 }
 0x75b   :  { %v2736_v54 = vpop.f32.mrf.mxu1  ;;  %5102 = vmatprep.subr.mxu0 %v3288_v53 }
 0x75c   :  { %5050 = vmatprep.mubr.msk.f32.mxu0 %vm2795_vm3, %v2736_v54  ;;  %5103 = vmatpush3.msra.mxu0 %v3288_v53 }
 0x75d   :  { %v5027_v26 = vpop.f32.mrf.mxu1  ;;  %5051 = vmatmul.mubr.msk.f32.gmra.mxu0 %vm2795_vm3, %v5024_v23  ;;  %5184 = vmatprep.subr.mxu0 %v6547_v25 }
 0x75f   :  { %v2746_v27 = vpop.f32.mrf.mxu1 }
 0x760   :  { %5053 = vmatprep.mubr.msk.f32.mxu0 %vm2795_vm3, %v2746_v27 }
 0x761   :  { %v5030_v30 = vpop.f32.mrf.mxu1  ;;  %5054 = vmatmul.mubr.msk.f32.gmra.mxu0 %vm2795_vm3, %v5027_v26 }
 0x763   :  { %v2756_v32 = vpop.f32.mrf.mxu1 }
 0x764   :  { %5056 = vmatprep.mubr.msk.f32.mxu0 %vm2795_vm3, %v2756_v32 }
 0x765   :  { %v5033_v33 = vpop.f32.mrf.mxu1  ;;  %5057 = vmatmul.mubr.msk.f32.gmra.mxu0 %vm2795_vm3, %v5030_v30 }
 0x767   :  { %v2766_v38 = vpop.f32.mrf.mxu1 }
 0x768   :  { %5059 = vmatprep.mubr.msk.f32.mxu0 %vm2795_vm3, %v2766_v38  ;;  %v3285_v38 = vld [vmem:[#allocation2 + $0x128] sm:$0xff] }
 0x769   :  { %v5036_v42 = vpop.f32.mrf.mxu1  ;;  %5060 = vmatmul.mubr.msk.f32.gmra.mxu0 %vm2795_vm3, %v5033_v33 }
 0x76b   :  { %v2776_v49 = vpop.f32.mrf.mxu1 }
 0x76c   :  { %5062 = vmatprep.mubr.msk.f32.mxu0 %vm2795_vm3, %v2776_v49 }
 0x76d   :  { %v5039_v50 = vpop.f32.mrf.mxu1  ;;  %5063 = vmatmul.mubr.msk.f32.gmra.mxu0 %vm2795_vm3, %v5036_v42 }
 0x76f   :  { %v2786_v52 = vpop.f32.mrf.mxu1 }
 0x770   :  { %5065 = vmatprep.mubr.msk.f32.mxu0 %vm2795_vm3, %v2786_v52 }
 0x771   :  { %5066 = vmatmul.mubr.msk.f32.gmra.mxu0 %vm2795_vm3, %v5039_v50  ;;  %v5074_v44 = vpop.f32.mrf.mxu1 }
 0x773   :  { %v3087_v3 = vpop.f32.mrf.mxu1 }
 0x775   :  { %v5077_v6 = vpop.f32.mrf.mxu1 }
 0x777   :  { %v3097_v45 = vpop.f32.mrf.mxu1 }
 0x779   :  { %v5080_v22 = vpop.f32.mrf.mxu1 }
 0x77b   :  { %v3107_v56 = vpop.f32.mrf.mxu1 }
 0x77d   :  { %v5083_v13 = vpop.f32.mrf.mxu1 }
 0x77f   :  { %v3117_v12 = vpop.f32.mrf.mxu1 }
 0x781   :  { %v5086_v37 = vpop.f32.mrf.mxu1 }
 0x783   :  { %v3127_v28 = vpop.f32.mrf.mxu1 }
 0x785   :  { %v5089_v27 = vpop.f32.mrf.mxu1 }
 0x787   :  { %v3137_v52 = vpop.f32.mrf.mxu1 }
 0x7a8   :  { %v2470_v58 = vpop.permute.xlu1 %2469 }
 0x7a9   :  { %2517 = vst.msk [vmem:[#allocation5 + $0x10] sm:$0xff] %vm2515_vm4, %v2470_v58 }
 0x7aa   :  { %v2468_v59 = vpop.permute.xlu0 %2467  ;;  %2582 = vst.msk [vmem:[#allocation5 + $0x10] sm:$0xff] %vm2580_vm5, %v6094_v31 }
 0x7ab   :  { %2516 = vst.msk [vmem:[#allocation5] sm:$0xff] %vm2515_vm4, %v2468_v59 }
 0x7ac   :  { %v2474_v63 = vpop.permute.xlu1 %2473  ;;  %2581 = vst.msk [vmem:[#allocation5] sm:$0xff] %vm2580_vm5, %v6108_v34 }
 0x7ad   :  { %2519 = vst.msk [vmem:[#allocation5 + $0x30] sm:$0xff] %vm2515_vm4, %v2474_v63  ;;  %v3284_v63 = vld [vmem:[#allocation2 + $0x120] sm:$0xff] }
 0x7ae   :  { %v2472_v29 = vpop.permute.xlu0 %2471  ;;  %2584 = vst.msk [vmem:[#allocation5 + $0x30] sm:$0xff] %vm2580_vm5, %v6122_v46 }
 0x7af   :  { %2518 = vst.msk [vmem:[#allocation5 + $0x20] sm:$0xff] %vm2515_vm4, %v2472_v29 }
 0x7b0   :  { %v2478_v16 = vpop.permute.xlu1 %2477  ;;  %2583 = vst.msk [vmem:[#allocation5 + $0x20] sm:$0xff] %vm2580_vm5, %v6124_v47  ;;  %v6837_v47 = vld [vmem:[#allocation9_spill] sm:$0xff] }
 0x7b1   :  { %2521 = vst.msk [vmem:[#allocation5 + $0x50] sm:$0xff] %vm2515_vm4, %v2478_v16 }
 0x7b2   :  { %v2476_v31 = vpop.permute.xlu0 %2475  ;;  %2586 = vst.msk [vmem:[#allocation5 + $0x50] sm:$0xff] %vm2580_vm5, %v6138_v51  ;;  %v6838_v51 = vld [vmem:[#allocation10_spill] sm:$0xff] }
 0x7b3   :  { %2520 = vst.msk [vmem:[#allocation5 + $0x40] sm:$0xff] %vm2515_vm4, %v2476_v31 }
 0x7b4   :  { %v2482_v34 = vpop.permute.xlu1 %2481  ;;  %2585 = vst.msk [vmem:[#allocation5 + $0x40] sm:$0xff] %vm2580_vm5, %v6836_v14 }
 0x7b5   :  { %2523 = vst.msk [vmem:[#allocation5 + $0x70] sm:$0xff] %vm2515_vm4, %v2482_v34  ;;  %v5092_v34 = vpop.f32.mrf.mxu1 }
 0x7b6   :  { %v2480_v46 = vpop.permute.xlu0 %2479  ;;  %2588 = vst.msk [vmem:[#allocation5 + $0x70] sm:$0xff] %vm2580_vm5, %v6837_v47 }
 0x7b7   :  { %2522 = vst.msk [vmem:[#allocation5 + $0x60] sm:$0xff] %vm2515_vm4, %v2480_v46 }
 0x7b8   :  { %v2486_v18 = vpop.permute.xlu1 %2485  ;;  %2587 = vst.msk [vmem:[#allocation5 + $0x60] sm:$0xff] %vm2580_vm5, %v6838_v51 }
 0x7b9   :  { %2525 = vst.msk [vmem:[#allocation5 + $0x90] sm:$0xff] %vm2515_vm4, %v2486_v18 }
 0x7ba   :  { %v2484_v5 = vpop.permute.xlu0 %2483  ;;  %2590 = vst.msk [vmem:[#allocation5 + $0x90] sm:$0xff] %vm2580_vm5, %v6839_v0 }
 0x7bb   :  { %2524 = vst.msk [vmem:[#allocation5 + $0x80] sm:$0xff] %vm2515_vm4, %v2484_v5  ;;  %v3147_v5 = vpop.f32.mrf.mxu1 }
 0x7bc   :  { %v2490_v48 = vpop.permute.xlu1 %2489  ;;  %2589 = vst.msk [vmem:[#allocation5 + $0x80] sm:$0xff] %vm2580_vm5, %v6840_v55 }
 0x7bd   :  { %2527 = vst.msk [vmem:[#allocation5 + $0xb0] sm:$0xff] %vm2515_vm4, %v2490_v48 }
 0x7be   :  { %v2488_v60 = vpop.permute.xlu0 %2487  ;;  %2592 = vst.msk [vmem:[#allocation5 + $0xb0] sm:$0xff] %vm2580_vm5, %v6841_v24 }
 0x7bf   :  { %2526 = vst.msk [vmem:[#allocation5 + $0xa0] sm:$0xff] %vm2515_vm4, %v2488_v60 }
 0x7c0   :  { %v2494_v62 = vpop.permute.xlu1 %2493  ;;  %2591 = vst.msk [vmem:[#allocation5 + $0xa0] sm:$0xff] %vm2580_vm5, %v6842_v10  ;;  %v5095_v10 = vpop.f32.mrf.mxu1 }
 0x7c1   :  { %2529 = vst.msk [vmem:[#allocation5 + $0xd0] sm:$0xff] %vm2515_vm4, %v2494_v62 }
 0x7c2   :  { %v2492_v11 = vpop.permute.xlu0 %2491  ;;  %2594 = vst.msk [vmem:[#allocation5 + $0xd0] sm:$0xff] %vm2580_vm5, %v6843_v4 }
 0x7c3   :  { %2528 = vst.msk [vmem:[#allocation5 + $0xc0] sm:$0xff] %vm2515_vm4, %v2492_v11 }
 0x7c4   :  { %v2498_v19 = vpop.permute.xlu1 %2497  ;;  %2593 = vst.msk [vmem:[#allocation5 + $0xc0] sm:$0xff] %vm2580_vm5, %v6844_v36 }
 0x7c5   :  { %2531 = vst.msk [vmem:[#allocation5 + $0xf0] sm:$0xff] %vm2515_vm4, %v2498_v19 }
 0x7c6   :  { %v2496_v17 = vpop.permute.xlu0 %2495  ;;  %2596 = vst.msk [vmem:[#allocation5 + $0xf0] sm:$0xff] %vm2580_vm5, %v6845_v2 }
 0x7c7   :  { %2530 = vst.msk [vmem:[#allocation5 + $0xe0] sm:$0xff] %vm2515_vm4, %v2496_v17 }
 0x7c8   :  { %2595 = vst.msk [vmem:[#allocation5 + $0xe0] sm:$0xff] %vm2580_vm5, %v6846_v40  ;;  %v3157_v40 = vpop.f32.mrf.mxu1 }
 0x815   :  { %v5046_v39 = vpop.f32.mrf.mxu0 }
 0x816   :  { %v3093_v57 = vadd.f32 %v5074_v44, %v5046_v39 }
 0x817   :  { %v2910_v35 = vpop.f32.mrf.mxu0 }
 0x818   :  { %v6588_v7 = vadd.f32 %v6585_v20, %v3093_v57  ;;  %v3088_v41 = vadd.f32 %v3087_v3, %v2910_v35 }
 0x819   :  { %v5049_v15 = vpop.f32.mrf.mxu0 }
 0x81a   :  { %v6591_v1 = vadd.f32 %v6585_v20, %v3088_v41  ;;  %v3103_v43 = vadd.f32 %v5077_v6, %v5049_v15  ;;  %3204 = vrot.lane.b32.xlu1 %v6588_v7, %s5342_s21 }
 0x81b   :  { %v2920_v8 = vpop.f32.mrf.mxu0 }
 0x81c   :  { %v6596_v9 = vadd.f32 %v6585_v20, %v3103_v43  ;;  %v3098_v21 = vadd.f32 %v3097_v45, %v2920_v8  ;;  %5104 = vmatprep.mubr.msk.f32.mxu0 %vm218_vm0, %v6591_v1  ;;  %3202 = vrot.lane.b32.xlu0 %v6591_v1, %s5342_s21 }
 0x81d   :  { %v5052_v23 = vpop.f32.mrf.mxu0  ;;  %5105 = vmatmul.mubr.msk.f32.vlgmr.msra.gmra.mxu0 %vm218_vm0, %v6588_v7 }
 0x81e   :  { %v6605_v54 = vadd.f32 %v6585_v20, %v3098_v21  ;;  %v3113_v26 = vadd.f32 %v5080_v22, %v5052_v23  ;;  %3208 = vrot.lane.b32.xlu1 %v6596_v9, %s5342_s21  ;;  %5185 = vmatpush3.msra.mxu0 %v6547_v25 }
 0x81f   :  { %v2930_v30 = vpop.f32.mrf.mxu0  ;;  %5186 = vmatprep.subr.mxu0 %v3286_v61 }
 0x820   :  { %v6611_v32 = vadd.f32 %v6585_v20, %v3113_v26  ;;  %v3108_v33 = vadd.f32 %v3107_v56, %v2930_v30  ;;  %5107 = vmatprep.mubr.msk.f32.mxu0 %vm218_vm0, %v6605_v54  ;;  %3206 = vrot.lane.b32.xlu0 %v6605_v54, %s5342_s21 }
 0x821   :  { %v5055_v42 = vpop.f32.mrf.mxu0  ;;  %5108 = vmatmul.mubr.msk.f32.gmra.mxu0 %vm218_vm0, %v6596_v9 }
 0x822   :  { %v6620_v49 = vadd.f32 %v6585_v20, %v3108_v33  ;;  %v3123_v50 = vadd.f32 %v5083_v13, %v5055_v42  ;;  %3212 = vrot.lane.b32.xlu1 %v6611_v32, %s5342_s21  ;;  %5187 = vmatpush3.msra.mxu0 %v3286_v61 }
 0x823   :  { %v2940_v53 = vpop.f32.mrf.mxu0  ;;  %5188 = vmatprep.subr.mxu0 %v3285_v38 }
 0x824   :  { %v6625_v58 = vadd.f32 %v6585_v20, %v3123_v50  ;;  %v3118_v59 = vadd.f32 %v3117_v12, %v2940_v53  ;;  %5110 = vmatprep.mubr.msk.f32.mxu0 %vm218_vm0, %v6620_v49  ;;  %3210 = vrot.lane.b32.xlu0 %v6620_v49, %s5342_s21 }
 0x825   :  { %v5058_v29 = vpop.f32.mrf.mxu0  ;;  %5111 = vmatmul.mubr.msk.f32.gmra.mxu0 %vm218_vm0, %v6611_v32 }
 0x826   :  { %v3176_v16 = vadd.f32 %v6585_v20, %v3118_v59  ;;  %v3133_v31 = vadd.f32 %v5086_v37, %v5058_v29  ;;  %3216 = vrot.lane.b32.xlu1 %v6625_v58, %s5342_s21  ;;  %5189 = vmatpush3.msra.mxu0 %v3285_v38  ;;  %v5277_v59 = vld [vmem:[%s6820_s0 + $0x10] sm:$0xff]  ;;  %v5279_v29 = vld [vmem:[%s6820_s0 + $0x20] sm:$0xff] }
 0x827   :  { %v2950_v25 = vpop.f32.mrf.mxu0  ;;  %5190 = vmatprep.subr.mxu0 %v3284_v63 }
 0x828   :  { %v3179_v14 = vadd.f32 %v6585_v20, %v3133_v31  ;;  %v3128_v46 = vadd.f32 %v3127_v28, %v2950_v25  ;;  %5113 = vmatprep.mubr.msk.f32.mxu0 %vm218_vm0, %v3176_v16  ;;  %3214 = vrot.lane.b32.xlu0 %v3176_v16, %s5342_s21  ;;  %v5281_v31 = vld [vmem:[%s6820_s0 + $0x30] sm:$0xff]  ;;  %v5283_v25 = vld [vmem:[%s6820_s0 + $0x40] sm:$0xff] }
 0x829   :  { %v5061_v47 = vpop.f32.mrf.mxu0  ;;  %5114 = vmatmul.mubr.msk.f32.gmra.mxu0 %vm218_vm0, %v6625_v58 }
 0x82a   :  { %v3178_v18 = vadd.f32 %v6585_v20, %v3128_v46  ;;  %v3143_v51 = vadd.f32 %v5089_v27, %v5061_v47  ;;  %3220 = vrot.lane.b32.xlu1 %v3179_v14, %s5342_s21  ;;  %5191 = vmatpush3.msra.mxu0 %v3284_v63  ;;  %v5278_v63 = vld [vmem:[%s6820_s0 + $0x18] sm:$0xff]  ;;  %v5285_v46 = vld [vmem:[%s6820_s0 + $0x50] sm:$0xff] }
 0x82b   :  { %v2960_v0 = vpop.f32.mrf.mxu0  ;;  %v5286_v47 = vld [vmem:[%s6820_s0 + $0x58] sm:$0xff] }
 0x82c   :  { %v3181_v48 = vadd.f32 %v6585_v20, %v3143_v51  ;;  %v3138_v55 = vadd.f32 %v3137_v52, %v2960_v0  ;;  %5116 = vmatprep.mubr.msk.f32.mxu0 %vm218_vm0, %v3178_v18  ;;  %3218 = vrot.lane.b32.xlu0 %v3178_v18, %s5342_s21  ;;  %v5288_v51 = vld [vmem:[%s6820_s0 + $0x68] sm:$0xff]  ;;  %v5290_v0 = vld [vmem:[%s6820_s0 + $0x78] sm:$0xff] }
 0x82d   :  { %v5064_v60 = vpop.f32.mrf.mxu0  ;;  %5117 = vmatmul.mubr.msk.f32.gmra.mxu0 %vm218_vm0, %v3179_v14 }
 0x82e   :  { %v3180_v24 = vadd.f32 %v6585_v20, %v3138_v55  ;;  %v3153_v62 = vadd.f32 %v5092_v34, %v5064_v60  ;;  %3224 = vrot.lane.b32.xlu1 %v3181_v48, %s5342_s21  ;;  %v5282_v34 = vld [vmem:[%s6820_s0 + $0x38] sm:$0xff] }
 0x82f   :  { %v2970_v11 = vpop.f32.mrf.mxu0 }
 0x830   :  { %v3183_v4 = vadd.f32 %v6585_v20, %v3153_v62  ;;  %v3148_v19 = vadd.f32 %v3147_v5, %v2970_v11  ;;  %5119 = vmatprep.mubr.msk.f32.mxu0 %vm218_vm0, %v3180_v24  ;;  %3222 = vrot.lane.b32.xlu0 %v3180_v24, %s5342_s21  ;;  %v5289_v5 = vld [vmem:[%s6820_s0 + $0x70] sm:$0xff] }
 0x831   :  { %v5067_v36 = vpop.f32.mrf.mxu0  ;;  %5120 = vmatmul.mubr.msk.f32.gmra.mxu0 %vm218_vm0, %v3181_v48 }
 0x832   :  { %v3182_v17 = vadd.f32 %v6585_v20, %v3148_v19  ;;  %v3163_v2 = vadd.f32 %v5095_v10, %v5067_v36  ;;  %3228 = vrot.lane.b32.xlu1 %v3183_v4, %s5342_s21  ;;  %v6767_v19 = vld [vmem:[%s6823_s3 + $0x5] ss:$0 sm:$0xff]  ;;  %s5344_s3 = smov [#allocation5]  }
 0x833   :  { %v2980_v44 = vpop.f32.mrf.mxu0  ;;  %s3866_s26 = sshll.u32 %s5344_s3, 4  ;;  %s3867_s26 = int_to_ptr.vmem [resolvable:$true] %s3866_s26 }
 0x834   :  { %v3185_v3 = vadd.f32 %v6585_v20, %v3163_v2  ;;  %v3158_v6 = vadd.f32 %v3157_v40, %v2980_v44  ;;  %5122 = vmatprep.mubr.msk.f32.mxu0 %vm218_vm0, %v3182_v17  ;;  %3226 = vrot.lane.b32.xlu0 %v3182_v17, %s5342_s21  ;;  %s5311_s27 = scalar_lea.vmem %s3867_s26, 4096  ;;  %p5316_p6 = scmp.lt.s32.totalorder %s3867_s26, %s3867_s26 }
 0x835   :  { %5123 = vmatmul.mubr.msk.f32.gmra.mxu0 %vm218_vm0, %v3183_v4  ;;  %p5312_p5 = scmp.ne.s32.totalorder %s3867_s26, %s5311_s27  ;;  %p5317_p7 = scmp.lt.s32.totalorder %s5311_s27, %s5311_s27 }
 0x836   :  { %v3184_v45 = vadd.f32 %v6585_v20, %v3158_v6  ;;  %3232 = vrot.lane.b32.xlu1 %v3185_v3, %s5342_s21 }
 0x837   :  { %p5318_p8 = por %p5317_p7, %p5316_p6 }
 0x838   :  { %5125 = vmatprep.mubr.msk.f32.mxu0 %vm218_vm0, %v3184_v45  ;;  %3230 = vrot.lane.b32.xlu0 %v3184_v45, %s5342_s21 }
 0x839   :  { %5126 = vmatmul.mubr.msk.f32.gmra.mxu0 %vm218_vm0, %v3185_v3  ;;  %p5319_p9 = pnand %p5318_p8, %p5312_p5 }
 0x83a   :  { %5192 = vmatprep.mubr.msk.f32.mxu0 %vm218_vm0, %v6591_v1 }
 0x83d   :  { %5193 = vmatmul.mubr.msk.f32.vlgmr.msra.gmra.mxu0 %vm218_vm0, %v6588_v7 }
 0x83e   :  { %5195 = vmatprep.mubr.msk.f32.mxu0 %vm218_vm0, %v6605_v54 }
 0x841   :  { %5196 = vmatmul.mubr.msk.f32.gmra.mxu0 %vm218_vm0, %v6596_v9 }
 0x842   :  { %5198 = vmatprep.mubr.msk.f32.mxu0 %vm218_vm0, %v6620_v49 }
 0x845   :  { %5199 = vmatmul.mubr.msk.f32.gmra.mxu0 %vm218_vm0, %v6611_v32 }
 0x846   :  { %5201 = vmatprep.mubr.msk.f32.mxu0 %vm218_vm0, %v3176_v16  ;;  %v5280_v16 = vld [vmem:[%s6820_s0 + $0x28] sm:$0xff] }
 0x849   :  { %5202 = vmatmul.mubr.msk.f32.gmra.mxu0 %vm218_vm0, %v6625_v58  ;;  %v5276_v58 = vld [vmem:[%s6820_s0 + $0x8] sm:$0xff] }
 0x84a   :  { %5204 = vmatprep.mubr.msk.f32.mxu0 %vm218_vm0, %v3178_v18  ;;  %v5287_v18 = vld [vmem:[%s6820_s0 + $0x60] sm:$0xff] }
 0x84d   :  { %5205 = vmatmul.mubr.msk.f32.gmra.mxu0 %vm218_vm0, %v3179_v14  ;;  %v5284_v14 = vld [vmem:[%s6820_s0 + $0x48] sm:$0xff]  ;;  %s5343_s0 = smov 24  }
 0x84e   :  { %5207 = vmatprep.mubr.msk.f32.mxu0 %vm218_vm0, %v3180_v24 }
 0x851   :  { %5208 = vmatmul.mubr.msk.f32.gmra.mxu0 %vm218_vm0, %v3181_v48 }
 0x852   :  { %5210 = vmatprep.mubr.msk.f32.mxu0 %vm218_vm0, %v3182_v17 }
 0x855   :  { %5211 = vmatmul.mubr.msk.f32.gmra.mxu0 %vm218_vm0, %v3183_v4 }
 0x856   :  { %5213 = vmatprep.mubr.msk.f32.mxu0 %vm218_vm0, %v3184_v45 }
 0x859   :  { %5214 = vmatmul.mubr.msk.f32.gmra.mxu0 %vm218_vm0, %v3185_v3 }
 0x88c   :  { %v3205_v22 = vpop.permute.xlu1 %3204 }
 0x88d   :  { %3254 = vst.msk [vmem:[#allocation5 + $0x10] sm:$0xff] %vm3250_vm6, %v3205_v22 }
 0x88e   :  { %3255 = vst.msk [vmem:[#allocation5 + $0x18] sm:$0xff] %vm3252_vm7, %v3205_v22  ;;  %v3203_v56 = vpop.permute.xlu0 %3202 }
 0x88f   :  { %3251 = vst.msk [vmem:[#allocation5] sm:$0xff] %vm3250_vm6, %v3203_v56 }
 0x890   :  { %3253 = vst.msk [vmem:[#allocation5 + $0x8] sm:$0xff] %vm3252_vm7, %v3203_v56  ;;  %v3209_v13 = vpop.permute.xlu1 %3208 }
 0x891   :  { %3258 = vst.msk [vmem:[#allocation5 + $0x30] sm:$0xff] %vm3250_vm6, %v3209_v13 }
 0x892   :  { %3259 = vst.msk [vmem:[#allocation5 + $0x38] sm:$0xff] %vm3252_vm7, %v3209_v13  ;;  %v3207_v12 = vpop.permute.xlu0 %3206 }
 0x893   :  { %3256 = vst.msk [vmem:[#allocation5 + $0x20] sm:$0xff] %vm3250_vm6, %v3207_v12 }
 0x894   :  { %3257 = vst.msk [vmem:[#allocation5 + $0x28] sm:$0xff] %vm3252_vm7, %v3207_v12  ;;  %v3213_v20 = vpop.permute.xlu1 %3212 }
 0x895   :  { %3262 = vst.msk [vmem:[#allocation5 + $0x50] sm:$0xff] %vm3250_vm6, %v3213_v20 }
 0x896   :  { %3263 = vst.msk [vmem:[#allocation5 + $0x58] sm:$0xff] %vm3252_vm7, %v3213_v20  ;;  %v3211_v39 = vpop.permute.xlu0 %3210 }
 0x897   :  { %3260 = vst.msk [vmem:[#allocation5 + $0x40] sm:$0xff] %vm3250_vm6, %v3211_v39 }
 0x898   :  { %3261 = vst.msk [vmem:[#allocation5 + $0x48] sm:$0xff] %vm3252_vm7, %v3211_v39  ;;  %v3217_v57 = vpop.permute.xlu1 %3216 }
 0x899   :  { %3266 = vst.msk [vmem:[#allocation5 + $0x70] sm:$0xff] %vm3250_vm6, %v3217_v57 }
 0x89a   :  { %3267 = vst.msk [vmem:[#allocation5 + $0x78] sm:$0xff] %vm3252_vm7, %v3217_v57  ;;  %v3215_v37 = vpop.permute.xlu0 %3214 }
 0x89b   :  { %3264 = vst.msk [vmem:[#allocation5 + $0x60] sm:$0xff] %vm3250_vm6, %v3215_v37 }
 0x89c   :  { %3265 = vst.msk [vmem:[#allocation5 + $0x68] sm:$0xff] %vm3252_vm7, %v3215_v37  ;;  %v3221_v35 = vpop.permute.xlu1 %3220 }
 0x89d   :  { %3270 = vst.msk [vmem:[#allocation5 + $0x90] sm:$0xff] %vm3250_vm6, %v3221_v35 }
 0x89e   :  { %3271 = vst.msk [vmem:[#allocation5 + $0x98] sm:$0xff] %vm3252_vm7, %v3221_v35  ;;  %v3219_v7 = vpop.permute.xlu0 %3218 }
 0x89f   :  { %3268 = vst.msk [vmem:[#allocation5 + $0x80] sm:$0xff] %vm3250_vm6, %v3219_v7 }
 0x8a0   :  { %3269 = vst.msk [vmem:[#allocation5 + $0x88] sm:$0xff] %vm3252_vm7, %v3219_v7  ;;  %v3225_v41 = vpop.permute.xlu1 %3224 }
 0x8a1   :  { %3274 = vst.msk [vmem:[#allocation5 + $0xb0] sm:$0xff] %vm3250_vm6, %v3225_v41 }
 0x8a2   :  { %3275 = vst.msk [vmem:[#allocation5 + $0xb8] sm:$0xff] %vm3252_vm7, %v3225_v41  ;;  %v3223_v15 = vpop.permute.xlu0 %3222 }
 0x8a3   :  { %3272 = vst.msk [vmem:[#allocation5 + $0xa0] sm:$0xff] %vm3250_vm6, %v3223_v15 }
 0x8a4   :  { %3273 = vst.msk [vmem:[#allocation5 + $0xa8] sm:$0xff] %vm3252_vm7, %v3223_v15  ;;  %v3229_v1 = vpop.permute.xlu1 %3228 }
 0x8a5   :  { %3278 = vst.msk [vmem:[#allocation5 + $0xd0] sm:$0xff] %vm3250_vm6, %v3229_v1 }
 0x8a6   :  { %3279 = vst.msk [vmem:[#allocation5 + $0xd8] sm:$0xff] %vm3252_vm7, %v3229_v1  ;;  %v3227_v43 = vpop.permute.xlu0 %3226 }
 0x8a7   :  { %3276 = vst.msk [vmem:[#allocation5 + $0xc0] sm:$0xff] %vm3250_vm6, %v3227_v43 }
 0x8a8   :  { %3277 = vst.msk [vmem:[#allocation5 + $0xc8] sm:$0xff] %vm3252_vm7, %v3227_v43  ;;  %v3233_v28 = vpop.permute.xlu1 %3232 }
 0x8a9   :  { %3282 = vst.msk [vmem:[#allocation5 + $0xf0] sm:$0xff] %vm3250_vm6, %v3233_v28 }
 0x8aa   :  { %3283 = vst.msk [vmem:[#allocation5 + $0xf8] sm:$0xff] %vm3252_vm7, %v3233_v28  ;;  %v3231_v8 = vpop.permute.xlu0 %3230 }
 0x8ab   :  { %3280 = vst.msk [vmem:[#allocation5 + $0xe0] sm:$0xff] %vm3250_vm6, %v3231_v8 }
 0x8ac   :  { %3281 = vst.msk [vmem:[#allocation5 + $0xe8] sm:$0xff] %vm3252_vm7, %v3231_v8 }
 0x8dd   :  { %v5106_v9 = vpop.f32.mrf.mxu0 }
 0x8df   :  { %v3391_v21 = vpop.f32.mrf.mxu0 }
 0x8e1   :  { %v5109_v61 = vpop.f32.mrf.mxu0 }
 0x8e3   :  { %v3401_v23 = vpop.f32.mrf.mxu0 }
 0x8e5   :  { %v5112_v54 = vpop.f32.mrf.mxu0 }
 0x8e7   :  { %v3411_v26 = vpop.f32.mrf.mxu0 }
 0x8e9   :  { %v5115_v27 = vpop.f32.mrf.mxu0 }
 0x8eb   :  { %v3421_v30 = vpop.f32.mrf.mxu0 }
 0x8ed   :  { %v5118_v32 = vpop.f32.mrf.mxu0 }
 0x8ef   :  { %v3431_v33 = vpop.f32.mrf.mxu0 }
 0x8f1   :  { %v5121_v38 = vpop.f32.mrf.mxu0 }
 0x8f3   :  { %v3441_v42 = vpop.f32.mrf.mxu0 }
 0x8f5   :  { %v5124_v49 = vpop.f32.mrf.mxu0 }
 0x8f7   :  { %v3451_v50 = vpop.f32.mrf.mxu0 }
 0x8f9   :  { %v5127_v52 = vpop.f32.mrf.mxu0 }
 0x8fa   :  { %5128 = vmatprep.subr.mxu1 %v5127_v52 }
 0x8fb   :  { %v3461_v53 = vpop.f32.mrf.mxu0  ;;  %5129 = vmatpush3.msra.mxu1 %v5127_v52 }
 0x8fc   :  { %5130 = vmatprep.subr.mxu1 %v3461_v53 }
 0x8fd   :  { %5131 = vmatpush3.msra.mxu1 %v3461_v53  ;;  %v5194_v48 = vpop.f32.mrf.mxu0 }
 0x8fe   :  { %5132 = vmatprep.subr.mxu1 %v5124_v49 }
 0x8ff   :  { %5133 = vmatpush3.msra.mxu1 %v5124_v49  ;;  %v3681_v55 = vpop.f32.mrf.mxu0 }
 0x900   :  { %5134 = vmatprep.subr.mxu1 %v3451_v50 }
 0x901   :  { %5135 = vmatpush3.msra.mxu1 %v3451_v50  ;;  %v5197_v60 = vpop.f32.mrf.mxu0 }
 0x902   :  { %5136 = vmatprep.subr.mxu1 %v5121_v38 }
 0x903   :  { %5137 = vmatpush3.msra.mxu1 %v5121_v38  ;;  %v3691_v24 = vpop.f32.mrf.mxu0 }
 0x904   :  { %5138 = vmatprep.subr.mxu1 %v3441_v42 }
 0x905   :  { %5139 = vmatpush3.msra.mxu1 %v3441_v42  ;;  %v5200_v62 = vpop.f32.mrf.mxu0 }
 0x906   :  { %5140 = vmatprep.subr.mxu1 %v5118_v32 }
 0x907   :  { %5141 = vmatpush3.msra.mxu1 %v5118_v32  ;;  %v3701_v10 = vpop.f32.mrf.mxu0 }
 0x908   :  { %5142 = vmatprep.subr.mxu1 %v3431_v33 }
 0x909   :  { %5143 = vmatpush3.msra.mxu1 %v3431_v33  ;;  %v5203_v11 = vpop.f32.mrf.mxu0 }
 0x90a   :  { %5144 = vmatprep.subr.mxu1 %v5115_v27 }
 0x90b   :  { %5145 = vmatpush3.msra.mxu1 %v5115_v27  ;;  %v3711_v4 = vpop.f32.mrf.mxu0 }
 0x90c   :  { %5146 = vmatprep.subr.mxu1 %v3421_v30 }
 0x90d   :  { %5147 = vmatpush3.msra.mxu1 %v3421_v30  ;;  %v5206_v2 = vpop.f32.mrf.mxu0 }
 0x90e   :  { %5148 = vmatprep.subr.mxu1 %v5112_v54 }
 0x90f   :  { %5149 = vmatpush3.msra.mxu1 %v5112_v54  ;;  %v3721_v56 = vpop.f32.mrf.mxu0 }
 0x910   :  { %5150 = vmatprep.subr.mxu1 %v3411_v26 }
 0x911   :  { %5151 = vmatpush3.msra.mxu1 %v3411_v26  ;;  %v5209_v35 = vpop.f32.mrf.mxu0 }
 0x912   :  { %5152 = vmatprep.subr.mxu1 %v5109_v61 }
 0x913   :  { %5153 = vmatpush3.msra.mxu1 %v5109_v61  ;;  %v3731_v8 = vpop.f32.mrf.mxu0 }
 0x914   :  { %5154 = vmatprep.subr.mxu1 %v3401_v23 }
 0x915   :  { %5155 = vmatpush3.msra.mxu1 %v3401_v23  ;;  %v5212_v27 = vpop.f32.mrf.mxu0 }
 0x916   :  { %5156 = vmatprep.subr.mxu1 %v5106_v9 }
 0x917   :  { %5157 = vmatpush3.msra.mxu1 %v5106_v9  ;;  %v3741_v50 = vpop.f32.mrf.mxu0 }
 0x918   :  { %5158 = vmatprep.subr.mxu1 %v3391_v21 }
 0x919   :  { %5159 = vmatpush3.msra.mxu1 %v3391_v21 }
 0x91a   :  { %5161 = vmatmul.mubr.f32.vlgmr.msra.gmra.mxu1 %v5276_v58 }
 0x91b   :  { %5163 = vmatprep.mubr.f32.mxu1 %v5277_v59 }
 0x91e   :  { %5164 = vmatmul.mubr.f32.gmra.mxu1 %v5278_v63 }
 0x91f   :  { %5166 = vmatprep.mubr.f32.mxu1 %v5279_v29 }
 0x922   :  { %5167 = vmatmul.mubr.f32.gmra.mxu1 %v5280_v16  ;;  %v5215_v16 = vpop.f32.mrf.mxu0 }
 0x923   :  { %5169 = vmatprep.mubr.f32.mxu1 %v5281_v31 }
 0x926   :  { %5170 = vmatmul.mubr.f32.gmra.mxu1 %v5282_v34 }
 0x927   :  { %5172 = vmatprep.mubr.f32.mxu1 %v5283_v25 }
 0x92a   :  { %5173 = vmatmul.mubr.f32.gmra.mxu1 %v5284_v14 }
 0x92b   :  { %5175 = vmatprep.mubr.f32.mxu1 %v5285_v46 }
 0x92e   :  { %5176 = vmatmul.mubr.f32.gmra.mxu1 %v5286_v47 }
 0x92f   :  { %5178 = vmatprep.mubr.f32.mxu1 %v5287_v18  ;;  %v3751_v18 = vpop.f32.mrf.mxu0 }
 0x932   :  { %5179 = vmatmul.mubr.f32.gmra.mxu1 %v5288_v51 }
 0x933   :  { %5181 = vmatprep.mubr.f32.mxu1 %v5289_v5 }
 0x936   :  { %5182 = vmatmul.mubr.f32.gmra.mxu1 %v5290_v0 }
 0x9da   :  { %v5162_v36 = vpop.f32.mrf.mxu1 }
 0x9db   :  { %v3687_v17 = vadd.f32 %v5194_v48, %v5162_v36 }
 0x9dc   :  { %v3536_v40 = vpop.f32.mrf.mxu1 }
 0x9dd   :  { %v3765_v44 = vadd.f32 %v6767_v19, %v3687_v17  ;;  %v3682_v3 = vadd.f32 %v3681_v55, %v3536_v40 }
 0x9de   :  { %v5165_v6 = vpop.f32.mrf.mxu1 }
 0x9df   :  { %v3764_v45 = vadd.f32 %v6767_v19, %v3682_v3  ;;  %v3697_v22 = vadd.f32 %v5197_v60, %v5165_v6  ;;  %3798 = vrot.lane.b32.xlu1 %v3765_v44, %s5343_s0 }
 0x9e0   :  { %v3546_v13 = vpop.f32.mrf.mxu1 }
 0x9e1   :  { %v3767_v12 = vadd.f32 %v6767_v19, %v3697_v22  ;;  %v3692_v20 = vadd.f32 %v3691_v24, %v3546_v13  ;;  %3796 = vrot.lane.b32.xlu0 %v3764_v45, %s5343_s0 }
 0x9e2   :  { %v5168_v39 = vpop.f32.mrf.mxu1 }
 0x9e3   :  { %v3766_v57 = vadd.f32 %v6767_v19, %v3692_v20  ;;  %v3707_v37 = vadd.f32 %v5200_v62, %v5168_v39  ;;  %3802 = vrot.lane.b32.xlu1 %v3767_v12, %s5343_s0 }
 0x9e4   :  { %v3556_v7 = vpop.f32.mrf.mxu1 }
 0x9e5   :  { %v3769_v41 = vadd.f32 %v6767_v19, %v3707_v37  ;;  %v3702_v15 = vadd.f32 %v3701_v10, %v3556_v7  ;;  %3800 = vrot.lane.b32.xlu0 %v3766_v57, %s5343_s0 }
 0x9e6   :  { %v5171_v1 = vpop.f32.mrf.mxu1 }
 0x9e7   :  { %v3768_v43 = vadd.f32 %v6767_v19, %v3702_v15  ;;  %v3717_v28 = vadd.f32 %v5203_v11, %v5171_v1  ;;  %3806 = vrot.lane.b32.xlu1 %v3769_v41, %s5343_s0 }
 0x9e8   :  { %v3566_v9 = vpop.f32.mrf.mxu1 }
 0x9e9   :  { %v3771_v21 = vadd.f32 %v6767_v19, %v3717_v28  ;;  %v3712_v61 = vadd.f32 %v3711_v4, %v3566_v9  ;;  %3804 = vrot.lane.b32.xlu0 %v3768_v43, %s5343_s0 }
 0x9ea   :  { %v5174_v23 = vpop.f32.mrf.mxu1 }
 0x9eb   :  { %v3770_v54 = vadd.f32 %v6767_v19, %v3712_v61  ;;  %v3727_v26 = vadd.f32 %v5206_v2, %v5174_v23  ;;  %3810 = vrot.lane.b32.xlu1 %v3771_v21, %s5343_s0 }
 0x9ec   :  { %v3576_v30 = vpop.f32.mrf.mxu1 }
 0x9ed   :  { %v3773_v32 = vadd.f32 %v6767_v19, %v3727_v26  ;;  %v3722_v33 = vadd.f32 %v3721_v56, %v3576_v30  ;;  %3808 = vrot.lane.b32.xlu0 %v3770_v54, %s5343_s0 }
 0x9ee   :  { %v5177_v38 = vpop.f32.mrf.mxu1 }
 0x9ef   :  { %v3772_v42 = vadd.f32 %v6767_v19, %v3722_v33  ;;  %v3737_v49 = vadd.f32 %v5209_v35, %v5177_v38  ;;  %3814 = vrot.lane.b32.xlu1 %v3773_v32, %s5343_s0 }
 0x9f0   :  { %v3586_v52 = vpop.f32.mrf.mxu1 }
 0x9f1   :  { %v3775_v53 = vadd.f32 %v6767_v19, %v3737_v49  ;;  %v3732_v58 = vadd.f32 %v3731_v8, %v3586_v52  ;;  %3812 = vrot.lane.b32.xlu0 %v3772_v42, %s5343_s0 }
 0x9f2   :  { %v5180_v59 = vpop.f32.mrf.mxu1 }
 0x9f3   :  { %v3774_v63 = vadd.f32 %v6767_v19, %v3732_v58  ;;  %v3747_v29 = vadd.f32 %v5212_v27, %v5180_v59  ;;  %3818 = vrot.lane.b32.xlu1 %v3775_v53, %s5343_s0 }
 0x9f4   :  { %v3596_v31 = vpop.f32.mrf.mxu1 }
 0x9f5   :  { %v3777_v34 = vadd.f32 %v6767_v19, %v3747_v29  ;;  %v3742_v25 = vadd.f32 %v3741_v50, %v3596_v31  ;;  %3816 = vrot.lane.b32.xlu0 %v3774_v63, %s5343_s0 }
 0x9f6   :  { %v5183_v14 = vpop.f32.mrf.mxu1 }
 0x9f7   :  { %v3776_v46 = vadd.f32 %v6767_v19, %v3742_v25  ;;  %v3757_v47 = vadd.f32 %v5215_v16, %v5183_v14  ;;  %3822 = vrot.lane.b32.xlu1 %v3777_v34, %s5343_s0 }
 0x9f8   :  { %v3606_v51 = vpop.f32.mrf.mxu1 }
 0x9f9   :  { %v3779_v5 = vadd.f32 %v6767_v19, %v3757_v47  ;;  %v3752_v0 = vadd.f32 %v3751_v18, %v3606_v51  ;;  %3820 = vrot.lane.b32.xlu0 %v3776_v46, %s5343_s0 }
 0x9fb   :  { %v3778_v48 = vadd.f32 %v6767_v19, %v3752_v0  ;;  %3826 = vrot.lane.b32.xlu1 %v3779_v5, %s5343_s0 }
 0x9fd   :  { %3824 = vrot.lane.b32.xlu0 %v3778_v48, %s5343_s0 }
 0xa51   :  { %v3799_v55 = vpop.permute.xlu1 %3798 }
 0xa52   :  { %3846 = vst.msk [vmem:[#allocation5 + $0x18] sm:$0xff] %vm3844_vm8, %v3799_v55 }
 0xa53   :  { %v3797_v60 = vpop.permute.xlu0 %3796 }
 0xa54   :  { %3845 = vst.msk [vmem:[#allocation5 + $0x8] sm:$0xff] %vm3844_vm8, %v3797_v60 }
 0xa55   :  { %v3803_v24 = vpop.permute.xlu1 %3802 }
 0xa56   :  { %3848 = vst.msk [vmem:[#allocation5 + $0x38] sm:$0xff] %vm3844_vm8, %v3803_v24 }
 0xa57   :  { %v3801_v62 = vpop.permute.xlu0 %3800 }
 0xa58   :  { %3847 = vst.msk [vmem:[#allocation5 + $0x28] sm:$0xff] %vm3844_vm8, %v3801_v62 }
 0xa59   :  { %v3807_v10 = vpop.permute.xlu1 %3806 }
 0xa5a   :  { %3850 = vst.msk [vmem:[#allocation5 + $0x58] sm:$0xff] %vm3844_vm8, %v3807_v10 }
 0xa5b   :  { %v3805_v11 = vpop.permute.xlu0 %3804 }
 0xa5c   :  { %3849 = vst.msk [vmem:[#allocation5 + $0x48] sm:$0xff] %vm3844_vm8, %v3805_v11 }
 0xa5d   :  { %v3811_v4 = vpop.permute.xlu1 %3810 }
 0xa5e   :  { %3852 = vst.msk [vmem:[#allocation5 + $0x78] sm:$0xff] %vm3844_vm8, %v3811_v4 }
 0xa5f   :  { %v3809_v19 = vpop.permute.xlu0 %3808 }
 0xa60   :  { %3851 = vst.msk [vmem:[#allocation5 + $0x68] sm:$0xff] %vm3844_vm8, %v3809_v19 }
 0xa61   :  { %v3815_v36 = vpop.permute.xlu1 %3814 }
 0xa62   :  { %3854 = vst.msk [vmem:[#allocation5 + $0x98] sm:$0xff] %vm3844_vm8, %v3815_v36 }
 0xa63   :  { %v3813_v17 = vpop.permute.xlu0 %3812 }
 0xa64   :  { %3853 = vst.msk [vmem:[#allocation5 + $0x88] sm:$0xff] %vm3844_vm8, %v3813_v17 }
 0xa65   :  { %v3819_v2 = vpop.permute.xlu1 %3818 }
 0xa66   :  { %3856 = vst.msk [vmem:[#allocation5 + $0xb8] sm:$0xff] %vm3844_vm8, %v3819_v2 }
 0xa67   :  { %v3817_v40 = vpop.permute.xlu0 %3816 }
 0xa68   :  { %3855 = vst.msk [vmem:[#allocation5 + $0xa8] sm:$0xff] %vm3844_vm8, %v3817_v40 }
 0xa69   :  { %v3823_v44 = vpop.permute.xlu1 %3822 }
 0xa6a   :  { %3858 = vst.msk [vmem:[#allocation5 + $0xd8] sm:$0xff] %vm3844_vm8, %v3823_v44 }
 0xa6b   :  { %v3821_v3 = vpop.permute.xlu0 %3820 }
 0xa6c   :  { %3857 = vst.msk [vmem:[#allocation5 + $0xc8] sm:$0xff] %vm3844_vm8, %v3821_v3 }
 0xa6d   :  { %v3827_v6 = vpop.permute.xlu1 %3826 }
 0xa6e   :  { %3860 = vst.msk [vmem:[#allocation5 + $0xf8] sm:$0xff] %vm3844_vm8, %v3827_v6 }
 0xa6f   :  { %v3825_v45 = vpop.permute.xlu0 %3824 }
 0xa70   :  { %3859 = vst.msk [vmem:[#allocation5 + $0xe8] sm:$0xff] %vm3844_vm8, %v3825_v45 }
 0xa71   :  { %5322 = shalt.err (!%p5319_p9)
}
 0xa72   :  { %s5345_s2 = smov 256   ;;  %s5346_s28 = smov 16  }
 0xa73   :  { %3872 = dma.vmem_to_hbm [thread:$0]  %s3867_s26, 4096, %s6824_s4, [#allocation4], %s5345_s2, %s5345_s2, %s5346_s28  }
 0xa74   :  { %5333 = dma.done.wait [#allocation4], 4096  }
 0xa75   :  { %5334 = vsyncadd [#allocation4], 4294963200 }
 0xa76   :  { %3876 = vsyncpa [#allocation3], 1 }
 0xa77   :  { %3877 = vsyncpa [#allocation4], 1 }

</bundles_post_ra>
